<compile_context>
chip_gen: v7x
topology: tpu7x:2x2x1
jax: 0.10.0
libtpu: 0.0.40
codegen_flags: <defaults>
</compile_context>

<pallas_src>
import jax
import jax.numpy as jnp
from jax import lax
from jax.experimental import pallas as pl
from jax.experimental.pallas import tpu as pltpu


# ----------------------------- Pallas kernel ---------------------------------

def _repvgg_block_kernel(xpad_ref, w3r_ref, b_ref, o_ref):
    """One batch element per grid step.

    xpad_ref : (1, H+2, W+2, Cp)  bf16 zero-padded NHWC input (channels padded)
    w3r_ref  : (3, 3*Cp, Cop)     bf16 reparam-folded weights, per-row packed
                                  with channel layout [dx=0 | dx=1 | dx=2]
    b_ref    : (1, Cop)           f32 reparam-folded bias
    o_ref    : (1, H*W, Cop)      f32 output (doubles as the f32 accumulator)
    """
    Wp2 = xpad_ref.shape[2]
    W = Wp2 - 2
    HW = o_ref.shape[1]
    H = HW // W
    K3 = w3r_ref.shape[1]                      # 3 * Cp

    # 3x3 conv as 3 deep matmuls: one per kernel row, K = 3*Cp.
    for dy in range(3):
        row = xpad_ref[0, dy:dy + H]           # (H, W+2, Cp) bf16
        patch = jnp.concatenate(
            [row[:, 0:W, :], row[:, 1:W + 1, :], row[:, 2:W + 2, :]],
            axis=-1)                           # (H, W, 3*Cp) bf16
        prod = jnp.dot(patch.reshape(HW, K3), w3r_ref[dy],
                       preferred_element_type=jnp.float32)   # (H*W, Cop) f32
        if dy == 0:
            o_ref[0] = prod                    # init accumulator (VMEM block)
        else:
            o_ref[0] += prod

    # Fused bias + ReLU epilogue in f32, lane-dense store.
    o_ref[0] = jnp.maximum(o_ref[0] + b_ref[...], 0.0).astype(o_ref.dtype)


# ----------------------------- wrapper ---------------------------------------

def _round_up(n, m):
    return ((n + m - 1) // m) * m


def repvgg_block_forward(x_nchw, w3r, bias, cout):
    """Forward of the multi-branch block (stride=(1,1)).

    x_nchw : (N, Cin, H, W) float32  (PyTorch layout)
    w3r    : (3, 3*Cp, Cop) bfloat16 reparam-folded, channel-padded weights
    bias   : (1, Cop)       float32  reparam-folded, channel-padded bias
    cout   : number of valid output channels
    """
    N, Cin, H, W = x_nchw.shape
    Cp = w3r.shape[1] // 3
    Cop = w3r.shape[2]

    # NCHW -> NHWC, bf16 cast, pad H/W by 1 and channels to lane-dense Cp.
    x = jnp.transpose(x_nchw, (0, 2, 3, 1)).astype(jnp.bfloat16)
    xpad = jnp.pad(x, ((0, 0), (1, 1), (1, 1), (0, Cp - Cin)))

    out_flat = pl.pallas_call(
        _repvgg_block_kernel,
        out_shape=jax.ShapeDtypeStruct((N, H * W, Cop), jnp.float32),
        grid_spec=pltpu.PrefetchScalarGridSpec(
            num_scalar_prefetch=0,
            grid=(N,),
            in_specs=[
                pl.BlockSpec((1, H + 2, W + 2, Cp), lambda n: (n, 0, 0, 0)),
                pl.BlockSpec((3, 3 * Cp, Cop), lambda n: (0, 0, 0)),
                pl.BlockSpec((1, Cop), lambda n: (0, 0)),
            ],
            out_specs=pl.BlockSpec((1, H * W, Cop), lambda n: (n, 0, 0)),
        ),
        compiler_params=pltpu.CompilerParams(
            dimension_semantics=("parallel",)),
    )(xpad, w3r, bias)

    out = out_flat.reshape(N, H, W, Cop)[:, :, :, :cout]
    return jnp.transpose(out, (0, 3, 1, 2))            # NHWC -> NCHW


# ---------------- parameter construction & exact reparam fold ----------------

def _fold_conv_bn(w_oihw, b, gamma, beta, mean, var, eps):
    """Exactly mirrors fcbn(): fold BN (eval mode) into conv weight + bias."""
    sf = gamma / jnp.sqrt(var + eps)
    fb = beta - sf * mean + sf * b
    fk = sf[:, None, None, None] * w_oihw
    return fk, fb


def make_block_params(key, channels):
    """Deterministic synthetic parameters for all three branches (stride=(1,1))."""
    C = channels
    ks = jax.random.split(key, 16)
    return dict(
        w3=0.1 * jax.random.normal(ks[0], (C, C, 3, 3), jnp.float32),
        b3=0.1 * jax.random.normal(ks[1], (C,), jnp.float32),
        g3=jax.random.uniform(ks[2], (C,), minval=0.5, maxval=1.5),
        be3=0.1 * jax.random.normal(ks[3], (C,)),
        rm3=0.1 * jax.random.normal(ks[4], (C,)),
        rv3=jax.random.uniform(ks[5], (C,), minval=0.5, maxval=1.5),
        w1=0.1 * jax.random.normal(ks[6], (C, C, 1, 1), jnp.float32),
        b1=0.1 * jax.random.normal(ks[7], (C,), jnp.float32),
        g1=jax.random.uniform(ks[8], (C,), minval=0.5, maxval=1.5),
        be1=0.1 * jax.random.normal(ks[9], (C,)),
        rm1=0.1 * jax.random.normal(ks[10], (C,)),
        rv1=jax.random.uniform(ks[11], (C,), minval=0.5, maxval=1.5),
        gz=jax.random.uniform(ks[12], (C,), minval=0.5, maxval=1.5),
        bez=0.1 * jax.random.normal(ks[13], (C,)),
        rmz=0.1 * jax.random.normal(ks[14], (C,)),
        rvz=jax.random.uniform(ks[15], (C,), minval=0.5, maxval=1.5),
    )


def fold_block_params(p, eps=1e-5):
    """Exact RepVGG fold of the three branches into one 3x3 conv + bias.

    Mathematically equivalent to the original multi-branch forward():
      Conv3x3+BN + Conv1x1+BN + BN(identity)  (stride=(1,1)).
    """
    fk3, fb3 = _fold_conv_bn(p['w3'], p['b3'], p['g3'], p['be3'],
                             p['rm3'], p['rv3'], eps)
    fk1, fb1 = _fold_conv_bn(p['w1'], p['b1'], p['g1'], p['be1'],
                             p['rm1'], p['rv1'], eps)
    sfz = p['gz'] / jnp.sqrt(p['rvz'] + eps)
    shz = p['bez'] - sfz * p['rmz']
    cout, cin = fk3.shape[:2]
    assert cin == cout, "identity-BN branch requires in_channels == out_channels"
    rwd = fk3.at[:, :, 1, 1].add(fk1[:, :, 0, 0])
    rwd = rwd.at[jnp.arange(cout), jnp.arange(cin), 1, 1].add(sfz)
    rbd = fb3 + fb1 + shz
    return rwd, rbd                            # (Cout, Cin, 3, 3), (Cout,)


def prepare_kernel_params(rwd_oihw, rbd):
    """Channel-pad to multiples of 128 (lane-dense), cast to bf16, and pack the
    weights per kernel-row as (3, 3*Cp, Cop) with channel layout [dx=0|dx=1|dx=2]."""
    cout, cin = rwd_oihw.shape[:2]
    cp = _round_up(cin, 128)
    cop = _round_up(cout, 128)
    w_hwio = jnp.transpose(rwd_oihw, (2, 3, 1, 0))           # (3, 3, Cin, Cout)
    w_hwio = jnp.pad(w_hwio, ((0, 0), (0, 0), (0, cp - cin), (0, cop - cout)))
    w3r = w_hwio.reshape(3, 3 * cp, cop).astype(jnp.bfloat16)
    bias = jnp.pad(rbd, (0, cop - cout)).reshape(1, cop).astype(jnp.float32)
    return w3r, bias


# ---------------- pure-JAX f32 reference (original multi-branch forward) -----

def reference_forward(x_nchw, p, eps=1e-5):
    fk3, fb3 = _fold_conv_bn(p['w3'], p['b3'], p['g3'], p['be3'],
                             p['rm3'], p['rv3'], eps)
    fk1, fb1 = _fold_conv_bn(p['w1'], p['b1'], p['g1'], p['be1'],
                             p['rm1'], p['rv1'], eps)
    sfz = p['gz'] / jnp.sqrt(p['rvz'] + eps)
    shz = p['bez'] - sfz * p['rmz']
    x = jnp.transpose(x_nchw, (0, 2, 3, 1))
    y3 = lax.conv_general_dilated(
        x, jnp.transpose(fk3, (2, 3, 1, 0)), window_strides=(1, 1),
        padding=((1, 1), (1, 1)),
        dimension_numbers=('NHWC', 'HWIO', 'NHWC')) + fb3
    y1 = jnp.einsum('nhwc,oc->nhwo', x, fk1[:, :, 0, 0]) + fb1
    yz = x * sfz + shz
    out = jax.nn.relu(y3 + y1 + yz)
    return jnp.transpose(out, (0, 3, 1, 2))


if __name__ == "__main__":
    key = jax.random.PRNGKey(0)
    k_x, k_p = jax.random.split(key)

    N, C, H, W = 2, 8, 16, 16          # identity branch requires in_ch == out_ch
    x = jax.random.normal(k_x, (N, C, H, W), jnp.float32)
    raw = make_block_params(k_p, C)

    rwd, rbd = fold_block_params(raw)          # exact reparam fold (wrapper side)
    w3r, bias = prepare_kernel_params(rwd, rbd)

    out = repvgg_block_forward(x, w3r, bias, cout=C)
    out = jax.block_until_ready(out)

    ref = jax.block_until_ready(reference_forward(x, raw))
    assert out.shape == (N, C, H, W)
    # bf16 activations/weights vs f32 reference -> loosened tolerance.
    assert jnp.allclose(out, ref, atol=5e-2, rtol=5e-2), (
        "mismatch vs JAX reference (max abs err %g)"
        % float(jnp.max(jnp.abs(out - ref))))

    print("KERNEL_OK")
</pallas_src>

<mosaic_0001>
module attributes {stable_mosaic.version = 11 : i64} {
  func.func @_repvgg_block_kernel(%arg0: i32, %arg1: memref<1x18x18x128xbf16, #tpu.memory_space<vmem>>, %arg2: memref<3x384x128xbf16, #tpu.memory_space<vmem>>, %arg3: memref<1x128xf32, #tpu.memory_space<vmem>>, %arg4: memref<1x256x128xf32, #tpu.memory_space<vmem>>) attributes {dimension_semantics = [#tpu.dimension_semantics<parallel>], iteration_bounds = array<i64: 2>, scalar_prefetch = 0 : i64, scratch_operands = 0 : i64, tpu.core_type = #tpu.core_type<tc>, window_params = [{transform_indices = @transform_0, window_bounds = array<i64: 1, 18, 18, 128>}, {pipeline_mode = #tpu.pipeline_mode<synchronous>, transform_indices = @transform_1, window_bounds = array<i64: 3, 384, 128>}, {pipeline_mode = #tpu.pipeline_mode<synchronous>, transform_indices = @transform_2, window_bounds = array<i64: 1, 128>}, {transform_indices = @transform_3, window_bounds = array<i64: 1, 256, 128>}]} {
    %c0 = arith.constant 0 : index
    %c0_0 = arith.constant 0 : index
    %c0_1 = arith.constant 0 : index
    %c0_2 = arith.constant 0 : index
    %0 = vector.load %arg1[%c0, %c0_0, %c0_1, %c0_2] : memref<1x18x18x128xbf16, #tpu.memory_space<vmem>>, vector<1x16x18x128xbf16>
    %1 = vector.shape_cast %0 : vector<1x16x18x128xbf16> to vector<16x18x128xbf16>
    %2 = vector.extract_strided_slice %1 {offsets = [0, 0, 0], sizes = [16, 16, 128], strides = [1, 1, 1]} : vector<16x18x128xbf16> to vector<16x16x128xbf16>
    %3 = vector.extract_strided_slice %1 {offsets = [0, 1, 0], sizes = [16, 16, 128], strides = [1, 1, 1]} : vector<16x18x128xbf16> to vector<16x16x128xbf16>
    %4 = vector.extract_strided_slice %1 {offsets = [0, 2, 0], sizes = [16, 16, 128], strides = [1, 1, 1]} : vector<16x18x128xbf16> to vector<16x16x128xbf16>
    %5 = tpu.concatenate %2, %3, %4 in 2 : vector<16x16x128xbf16>, vector<16x16x128xbf16>, vector<16x16x128xbf16> -> vector<16x16x384xbf16>
    %6 = vector.shape_cast %5 : vector<16x16x384xbf16> to vector<256x384xbf16>
    %c0_3 = arith.constant 0 : index
    %c0_4 = arith.constant 0 : index
    %c0_5 = arith.constant 0 : index
    %7 = vector.load %arg2[%c0_3, %c0_4, %c0_5] : memref<3x384x128xbf16, #tpu.memory_space<vmem>>, vector<1x384x128xbf16>
    %8 = vector.shape_cast %7 : vector<1x384x128xbf16> to vector<384x128xbf16>
    %cst = arith.constant dense<0.000000e+00> : vector<256x128xf32>
    %9 = tpu.matmul %6, %8, %cst {dimension_numbers = #tpu.dot_dimension_numbers<[1], [0], [0], [1], [0, 0, 1, 1], [], []>} : vector<256x384xbf16>, vector<384x128xbf16>, vector<256x128xf32> -> vector<256x128xf32>
    %c0_6 = arith.constant 0 : index
    %c0_7 = arith.constant 0 : index
    %c0_8 = arith.constant 0 : index
    %10 = vector.load %arg4[%c0_6, %c0_7, %c0_8] : memref<1x256x128xf32, #tpu.memory_space<vmem>>, vector<1x256x128xf32>
    %11 = vector.shape_cast %10 : vector<1x256x128xf32> to vector<256x128xf32>
    %12 = vector.shape_cast %9 : vector<256x128xf32> to vector<1x256x128xf32>
    tpu.vector_store %arg4[%c0_6, %c0_7, %c0_8], %12 {strides = array<i32>} : memref<1x256x128xf32, #tpu.memory_space<vmem>>, vector<1x256x128xf32>,
    %c0_9 = arith.constant 0 : index
    %c1 = arith.constant 1 : index
    %c0_10 = arith.constant 0 : index
    %c0_11 = arith.constant 0 : index
    %13 = vector.load %arg1[%c0_9, %c1, %c0_10, %c0_11] : memref<1x18x18x128xbf16, #tpu.memory_space<vmem>>, vector<1x16x18x128xbf16>
    %14 = vector.shape_cast %13 : vector<1x16x18x128xbf16> to vector<16x18x128xbf16>
    %15 = vector.extract_strided_slice %14 {offsets = [0, 0, 0], sizes = [16, 16, 128], strides = [1, 1, 1]} : vector<16x18x128xbf16> to vector<16x16x128xbf16>
    %16 = vector.extract_strided_slice %14 {offsets = [0, 1, 0], sizes = [16, 16, 128], strides = [1, 1, 1]} : vector<16x18x128xbf16> to vector<16x16x128xbf16>
    %17 = vector.extract_strided_slice %14 {offsets = [0, 2, 0], sizes = [16, 16, 128], strides = [1, 1, 1]} : vector<16x18x128xbf16> to vector<16x16x128xbf16>
    %18 = tpu.concatenate %15, %16, %17 in 2 : vector<16x16x128xbf16>, vector<16x16x128xbf16>, vector<16x16x128xbf16> -> vector<16x16x384xbf16>
    %19 = vector.shape_cast %18 : vector<16x16x384xbf16> to vector<256x384xbf16>
    %c1_12 = arith.constant 1 : index
    %c0_13 = arith.constant 0 : index
    %c0_14 = arith.constant 0 : index
    %20 = vector.load %arg2[%c1_12, %c0_13, %c0_14] : memref<3x384x128xbf16, #tpu.memory_space<vmem>>, vector<1x384x128xbf16>
    %21 = vector.shape_cast %20 : vector<1x384x128xbf16> to vector<384x128xbf16>
    %cst_15 = arith.constant dense<0.000000e+00> : vector<256x128xf32>
    %22 = tpu.matmul %19, %21, %cst_15 {dimension_numbers = #tpu.dot_dimension_numbers<[1], [0], [0], [1], [0, 0, 1, 1], [], []>} : vector<256x384xbf16>, vector<384x128xbf16>, vector<256x128xf32> -> vector<256x128xf32>
    %c0_16 = arith.constant 0 : index
    %c0_17 = arith.constant 0 : index
    %c0_18 = arith.constant 0 : index
    %23 = vector.load %arg4[%c0_16, %c0_17, %c0_18] : memref<1x256x128xf32, #tpu.memory_space<vmem>>, vector<1x256x128xf32>
    %24 = vector.shape_cast %23 : vector<1x256x128xf32> to vector<256x128xf32>
    %25 = arith.addf %24, %22 : vector<256x128xf32>
    %c0_19 = arith.constant 0 : index
    %c0_20 = arith.constant 0 : index
    %c0_21 = arith.constant 0 : index
    %26 = vector.load %arg4[%c0_19, %c0_20, %c0_21] : memref<1x256x128xf32, #tpu.memory_space<vmem>>, vector<1x256x128xf32>
    %27 = vector.shape_cast %26 : vector<1x256x128xf32> to vector<256x128xf32>
    %28 = vector.shape_cast %25 : vector<256x128xf32> to vector<1x256x128xf32>
    tpu.vector_store %arg4[%c0_19, %c0_20, %c0_21], %28 {strides = array<i32>} : memref<1x256x128xf32, #tpu.memory_space<vmem>>, vector<1x256x128xf32>,
    %c0_22 = arith.constant 0 : index
    %c2 = arith.constant 2 : index
    %c0_23 = arith.constant 0 : index
    %c0_24 = arith.constant 0 : index
    %29 = vector.load %arg1[%c0_22, %c2, %c0_23, %c0_24] : memref<1x18x18x128xbf16, #tpu.memory_space<vmem>>, vector<1x16x18x128xbf16>
    %30 = vector.shape_cast %29 : vector<1x16x18x128xbf16> to vector<16x18x128xbf16>
    %31 = vector.extract_strided_slice %30 {offsets = [0, 0, 0], sizes = [16, 16, 128], strides = [1, 1, 1]} : vector<16x18x128xbf16> to vector<16x16x128xbf16>
    %32 = vector.extract_strided_slice %30 {offsets = [0, 1, 0], sizes = [16, 16, 128], strides = [1, 1, 1]} : vector<16x18x128xbf16> to vector<16x16x128xbf16>
    %33 = vector.extract_strided_slice %30 {offsets = [0, 2, 0], sizes = [16, 16, 128], strides = [1, 1, 1]} : vector<16x18x128xbf16> to vector<16x16x128xbf16>
    %34 = tpu.concatenate %31, %32, %33 in 2 : vector<16x16x128xbf16>, vector<16x16x128xbf16>, vector<16x16x128xbf16> -> vector<16x16x384xbf16>
    %35 = vector.shape_cast %34 : vector<16x16x384xbf16> to vector<256x384xbf16>
    %c2_25 = arith.constant 2 : index
    %c0_26 = arith.constant 0 : index
    %c0_27 = arith.constant 0 : index
    %36 = vector.load %arg2[%c2_25, %c0_26, %c0_27] : memref<3x384x128xbf16, #tpu.memory_space<vmem>>, vector<1x384x128xbf16>
    %37 = vector.shape_cast %36 : vector<1x384x128xbf16> to vector<384x128xbf16>
    %cst_28 = arith.constant dense<0.000000e+00> : vector<256x128xf32>
    %38 = tpu.matmul %35, %37, %cst_28 {dimension_numbers = #tpu.dot_dimension_numbers<[1], [0], [0], [1], [0, 0, 1, 1], [], []>} : vector<256x384xbf16>, vector<384x128xbf16>, vector<256x128xf32> -> vector<256x128xf32>
    %c0_29 = arith.constant 0 : index
    %c0_30 = arith.constant 0 : index
    %c0_31 = arith.constant 0 : index
    %39 = vector.load %arg4[%c0_29, %c0_30, %c0_31] : memref<1x256x128xf32, #tpu.memory_space<vmem>>, vector<1x256x128xf32>
    %40 = vector.shape_cast %39 : vector<1x256x128xf32> to vector<256x128xf32>
    %41 = arith.addf %40, %38 : vector<256x128xf32>
    %c0_32 = arith.constant 0 : index
    %c0_33 = arith.constant 0 : index
    %c0_34 = arith.constant 0 : index
    %42 = vector.load %arg4[%c0_32, %c0_33, %c0_34] : memref<1x256x128xf32, #tpu.memory_space<vmem>>, vector<1x256x128xf32>
    %43 = vector.shape_cast %42 : vector<1x256x128xf32> to vector<256x128xf32>
    %44 = vector.shape_cast %41 : vector<256x128xf32> to vector<1x256x128xf32>
    tpu.vector_store %arg4[%c0_32, %c0_33, %c0_34], %44 {strides = array<i32>} : memref<1x256x128xf32, #tpu.memory_space<vmem>>, vector<1x256x128xf32>,
    %c0_35 = arith.constant 0 : index
    %c0_36 = arith.constant 0 : index
    %c0_37 = arith.constant 0 : index
    %45 = vector.load %arg4[%c0_35, %c0_36, %c0_37] : memref<1x256x128xf32, #tpu.memory_space<vmem>>, vector<1x256x128xf32>
    %46 = vector.shape_cast %45 : vector<1x256x128xf32> to vector<256x128xf32>
    %c0_38 = arith.constant 0 : index
    %c0_39 = arith.constant 0 : index
    %47 = vector.load %arg3[%c0_38, %c0_39] : memref<1x128xf32, #tpu.memory_space<vmem>>, vector<1x128xf32>
    %48 = vector.broadcast %47 : vector<1x128xf32> to vector<256x128xf32>
    %49 = arith.addf %46, %48 : vector<256x128xf32>
    %cst_40 = arith.constant 0.000000e+00 : f32
    %50 = vector.broadcast %cst_40 : f32 to vector<256x128xf32>
    %51 = arith.maximumf %49, %50 : vector<256x128xf32>
    %c0_41 = arith.constant 0 : index
    %c0_42 = arith.constant 0 : index
    %c0_43 = arith.constant 0 : index
    %52 = vector.load %arg4[%c0_41, %c0_42, %c0_43] : memref<1x256x128xf32, #tpu.memory_space<vmem>>, vector<1x256x128xf32>
    %53 = vector.shape_cast %52 : vector<1x256x128xf32> to vector<256x128xf32>
    %54 = vector.shape_cast %51 : vector<256x128xf32> to vector<1x256x128xf32>
    tpu.vector_store %arg4[%c0_41, %c0_42, %c0_43], %54 {strides = array<i32>} : memref<1x256x128xf32, #tpu.memory_space<vmem>>, vector<1x256x128xf32>,
    return
  }
  func.func @transform_0(%arg0: i32) -> (i32, i32, i32, i32) {
    %c0_i32 = arith.constant 0 : i32
    %c0_i32_0 = arith.constant 0 : i32
    %c0_i32_1 = arith.constant 0 : i32
    %c0_i32_2 = arith.constant 0 : i32
    return %arg0, %c0_i32, %c0_i32_0, %c0_i32_1 : i32, i32, i32, i32
  }
  func.func @transform_1(%arg0: i32) -> (i32, i32, i32) {
    %c0_i32 = arith.constant 0 : i32
    %c0_i32_0 = arith.constant 0 : i32
    %c0_i32_1 = arith.constant 0 : i32
    %c0_i32_2 = arith.constant 0 : i32
    return %c0_i32, %c0_i32_0, %c0_i32_1 : i32, i32, i32
  }
  func.func @transform_2(%arg0: i32) -> (i32, i32) {
    %c0_i32 = arith.constant 0 : i32
    %c0_i32_0 = arith.constant 0 : i32
    %c0_i32_1 = arith.constant 0 : i32
    return %c0_i32, %c0_i32_0 : i32, i32
  }
  func.func @transform_3(%arg0: i32) -> (i32, i32, i32) {
    %c0_i32 = arith.constant 0 : i32
    %c0_i32_0 = arith.constant 0 : i32
    %c0_i32_1 = arith.constant 0 : i32
    return %arg0, %c0_i32, %c0_i32_0 : i32, i32, i32
  }
}

</mosaic_0001>

<bundles_post_ra>
// kernel: tpu_custom_call.1
= control target key start
LH: loop header
LB: loop body
LE: loop exit
PB: predicated region body
PF: predicated region fallthrough
CT: control target
= control target key end

     0   :  { %8 = vsyncpa [#allocation3], 0  ;;  %s6536_s0 = inlined_call_operand.vmem [shape: bf16[2,18,18,128], index: 0, kind: input, shape index: {}]   ;;  %s6537_s1 = inlined_call_operand.vmem [shape: bf16[3,384,128], index: 1, kind: input, shape index: {}]   ;;  %s6538_s2 = inlined_call_operand.vmem [shape: f32[1,128], index: 2, kind: input, shape index: {}]   ;;  %s6539_s3 = inlined_call_operand.hbm [shape: f32[2,256,128], index: 3, kind: output, shape index: {}]  }
   0x1   :  { %10 = vsyncpa [#allocation3 + $0x1], 0  ;;  %s5149_s12 = smov 0   ;;  %s5151_s13 = smov 0  }
   0x2   :  { %s5153_s14 = smov 0   ;;  %s5155_s15 = smov 0  }
   0x3 LB: > { %s5170_s16 = sadd.s32 4294967295, %s5124_s15   ;;  %s3545_s17 = sadd.s32 4294967294, %s5124_s15   ;;  %s5124_s15 = sphi %s5155_s15, %s6547_s15   ;;  %s5120_s14 = sphi %s5153_s14, %s6546_s14   ;;  %s5116_s13 = sphi %s5151_s13, %s6545_s13   ;;  %s5112_s12 = sphi %s5149_s12, %s6544_s12  }
   0x4   : > { %s5174_s18 = sadd.s32 1, %s5124_s15   ;;  %s91_s19 = sadd.s32 1, %s5120_s14 }
   0x5   : > { %s88_s20 = ssub.s32 %s5124_s15, %s5174_s18  ;;  %p101_p0 = scmp.ne.s32.totalorder %s5120_s14, %s5116_s13 }
   0x6   : > { %p89_p1 = scmp.eq.s32.totalorder %s88_s20, 0  ;;  %p102_p2 = scmp.eq.s32.totalorder %s5170_s16, 1 }
   0x7   : > { %p107_p3 = scmp.ne.s32.totalorder %s5116_s13, %s5112_s12  ;;  %p108_p4 = scmp.eq.s32.totalorder %s3545_s17, 1 }
   0x8   : > { %s5185_s21 = scalar_select %p89_p1, %s5120_s14, %s91_s19  }
   0x9   : > { %p5187_p5 = por %p102_p2, %p101_p0  ;;  %p5191_p6 = por %p108_p4, %p107_p3 }
   0xa   : > { %p3548_p7 = scmp.ge.s32.totalorder %s5124_s15, 1  ;;  %p140_p8 = scmp.lt.s32.totalorder %s5124_s15, 3 }
   0xc   : > { %p141_p9 = pnand %p3548_p7, %p140_p8 }
   0xe   : > { %144 = sbr.rel (%p141_p9) target bundleno = 575 (0x23f), region = 32 }
  0x15   : > { %v4880_v0 = vld [vmem:[%s6537_s1 + $0x40] sm:$0xff]   ;;  %v4883_v3 = vld [vmem:[%s6537_s1 + $0x48] sm:$0xff]   ;;  %v4886_v6 = vld [vmem:[%s6537_s1 + $0x50] sm:$0xff]   ;;  %p164_p10 = scmp.lt.s32.totalorder %s5170_s16, 1  ;;  %vm571_vm0 = vcmask 1046528   ;;  %s3917_s17 = sshll.u32 %s5170_s16, 12 }
  0x16   : > { %v5203_v1 = vld [vmem:[%s6537_s1 + $0x80] sm:$0xff]   ;;  %3918 = vmatprep.subr.bf16.mxu0 %v4880_v0  ;;  %v5216_v4 = vld [vmem:[%s6537_s1 + $0x88] sm:$0xff]   ;;  %v5228_v7 = vld [vmem:[%s6537_s1 + $0x90] sm:$0xff]   ;;  %vm362_vm1 = vsmask.f32 7424  ;;  %s6486_s25 = scalar_lea.hbm %s6539_s3, %s3917_s17  ;;  %s5126_s27 = smov [#allocation2]  }
  0x17   : > { %v4882_v2 = vld [vmem:[%s6537_s1] sm:$0xff]   ;;  %4470 = vmatprep.subr.bf16.mxu1 %v5203_v1  ;;  %v4885_v5 = vld [vmem:[%s6537_s1 + $0x8] sm:$0xff]   ;;  %v4888_v8 = vld [vmem:[%s6537_s1 + $0x10] sm:$0xff]   ;;  %s165_s7 = scalar_select %p164_p10, %s5170_s16, 1 }
  0x18   : > { %3919 = vmatpush3.bf16.msra.mxu0 %v4882_v2  ;;  %4478 = vmatpush3.bf16.msra.mxu1 %v5203_v1  ;;  %v4889_v9 = vld [vmem:[%s6537_s1 + $0x58] sm:$0xff]   ;;  %v4892_v12 = vld [vmem:[%s6537_s1 + $0x60] sm:$0xff]   ;;  %v4895_v15 = vld [vmem:[%s6537_s1 + $0x68] sm:$0xff]   ;;  %s5066_s28 = sshll.u32 %s5126_s27, 4  ;;  %s5067_s28 = int_to_ptr.vmem [resolvable:$false] %s5066_s28 }
  0x19   : > { %3920 = vmatprep.subr.bf16.mxu0 %v4883_v3  ;;  %4471 = vmatprep.subr.bf16.mxu1 %v5216_v4  ;;  %v5241_v10 = vld [vmem:[%s6537_s1 + $0x98] sm:$0xff]   ;;  %v5255_v13 = vld [vmem:[%s6537_s1 + $0xa0] sm:$0xff]   ;;  %v5269_v16 = vld [vmem:[%s6537_s1 + $0xa8] sm:$0xff]   ;;  %s4838_s20 = smul.u32 216, %s165_s7  ;;  %s5068_s29 = scalar_lea.vmem %s5067_s28, 8192 }
  0x1a   : > { %v4891_v11 = vld [vmem:[%s6537_s1 + $0x18] sm:$0xff]   ;;  %v4894_v14 = vld [vmem:[%s6537_s1 + $0x20] sm:$0xff]   ;;  %v4897_v17 = vld [vmem:[%s6537_s1 + $0x28] sm:$0xff]  }
  0x1b   : > { %v4898_v18 = vld [vmem:[%s6537_s1 + $0x70] sm:$0xff]   ;;  %s5290_s7 = scalar_lea.vmem %s6536_s0, %s4838_s20  ;;  %v4901_v21 = vld [vmem:[%s6537_s1 + $0x78] sm:$0xff]   ;;  %v4910_v35 = vld [vmem:[%s6537_s1 + $0x100] sm:$0xff]  }
  0x1c   : > { %3921 = vmatpush3.bf16.msra.mxu0 %v4885_v5  ;;  %4479 = vmatpush3.bf16.msra.mxu1 %v5216_v4  ;;  %v5282_v19 = vld [vmem:[%s6537_s1 + $0xb0] sm:$0xff]   ;;  %v5298_v22 = vld [vmem:[%s6537_s1 + $0xb8] sm:$0xff]   ;;  %v4904_v23 = vld [vmem:[%s5290_s7] sm:$0xff]  }
  0x1d   : > { %3922 = vmatprep.subr.bf16.mxu0 %v4886_v6  ;;  %4472 = vmatprep.subr.bf16.mxu1 %v5228_v7  ;;  %v4900_v20 = vld [vmem:[%s6537_s1 + $0x30] sm:$0xff]   ;;  %v4905_v24 = vld [vmem:[%s5290_s7 + $0x8] ss:$0 sps:$4 sm:$0x11]   ;;  %v4903_v25 = vld [vmem:[%s6537_s1 + $0x38] sm:$0xff]   ;;  %v364_v26 = vshrl.u32 %v4904_v23, 16 }
  0x1e   : > { %v366_v27 = vshll.u32 %v4904_v23, 16  ;;  %v371_v28 = vshll.u32 %v4905_v24, 16  ;;  %v5308_v29 = vld [vmem:[%s5290_s7 + $0x60] sm:$0xff]   ;;  %v5312_v30 = vld [vmem:[%s5290_s7 + $0x68] ss:$0 sps:$4 sm:$0x11]  }
  0x1f   : > { %v5315_v31 = vld [vmem:[%s5290_s7 + $0x6c] sm:$0xff]   ;;  %v596_v34 = vrot.slane %v5308_v29, 1  ;;  %v597_v36 = vrot.slane %v5312_v30, 1  ;;  %v5324_v37 = vld [vmem:[%s5290_s7 + $0x74] ss:$0 sps:$4 sm:$0x11]  }
  0x20   : > { %3923 = vmatpush3.bf16.msra.mxu0 %v4888_v8  ;;  %4480 = vmatpush3.bf16.msra.mxu1 %v5228_v7  ;;  %v368_v32 = vrot.slane %v366_v27, 1  ;;  %v373_v33 = vrot.slane %v371_v28, 1  ;;  %v599_v38 = vrot.slane %v5315_v31, 1  ;;  %v4911_v39 = vld [vmem:[%s6537_s1 + $0xc0] sm:$0xff]   ;;  %v600_v42 = vrot.slane %v5324_v37, 1  ;;  %v4912_v43 = vld [vmem:[%s6537_s1 + $0x108] sm:$0xff]  }
  0x21   : > { %3924 = vmatprep.subr.bf16.mxu0 %v4889_v9  ;;  %4473 = vmatprep.subr.bf16.mxu1 %v5241_v10  ;;  %v598_v41 = vsel %vm571_vm0, %v596_v34, %v597_v36  ;;  %v4913_v46 = vld [vmem:[%s6537_s1 + $0xc8] sm:$0xff]   ;;  %v4915_v48 = vld [vmem:[%s5290_s7 + $0x14] ss:$0 sps:$4 sm:$0x11]   ;;  %v5346_v52 = vld [vmem:[%s5290_s7 + $0x78] sm:$0xff]  }
  0x22   : > { %v369_v40 = vor.u32 %v368_v32, %v364_v26  ;;  %4358 = vmatprep.mubr.bf16.mxu1 %v598_v41  ;;  %v601_v45 = vsel %vm571_vm0, %v599_v38, %v600_v42  ;;  %v4914_v47 = vld [vmem:[%s5290_s7 + $0xc] sm:$0xff]   ;;  %v383_v51 = vshll.u32 %v4915_v48, 16  ;;  %v5350_v53 = vld [vmem:[%s5290_s7 + $0x80] ss:$0 sps:$4 sm:$0x11]   ;;  %v5353_v54 = vld [vmem:[%s5290_s7 + $0x84] sm:$0xff]  }
  0x23   : > { %v376_v49 = vshrl.u32 %v4914_v47, 16  ;;  %v378_v50 = vshll.u32 %v4914_v47, 16  ;;  %v602_v57 = vrot.slane %v5346_v52, 1  ;;  %v4920_v58 = vld [vmem:[%s6537_s1 + $0x110] sm:$0xff]   ;;  %v603_v59 = vrot.slane %v5350_v53, 1  ;;  %v4922_v2 = vld [vmem:[%s6537_s1 + $0x118] sm:$0xff]  }
  0x24   : > { %3925 = vmatpush3.bf16.msra.mxu0 %v4891_v11  ;;  %4481 = vmatpush3.bf16.msra.mxu1 %v5241_v10  ;;  %v374_v44 = vsel %vm362_vm1, %v369_v40, %v373_v33  ;;  %v385_v56 = vrot.slane %v383_v51, 1  ;;  %v5361_v60 = vld [vmem:[%s5290_s7 + $0x8c] ss:$0 sps:$4 sm:$0x11]   ;;  %v605_v61 = vrot.slane %v5353_v54, 1  ;;  %v4921_v62 = vld [vmem:[%s6537_s1 + $0xd0] sm:$0xff]  }
  0x25   : > { %3926 = vmatprep.subr.bf16.mxu0 %v4892_v12  ;;  %4474 = vmatprep.subr.bf16.mxu1 %v5255_v13  ;;  %v380_v55 = vrot.slane %v378_v50, 1  ;;  %v604_v0 = vsel %vm571_vm0, %v602_v57, %v603_v59  ;;  %v4923_v5 = vld [vmem:[%s6537_s1 + $0xd8] sm:$0xff]   ;;  %v4925_v8 = vld [vmem:[%s5290_s7 + $0x20] ss:$0 sps:$4 sm:$0x11]   ;;  %v4932_v33 = vld [vmem:[%s6537_s1 + $0x128] sm:$0xff]  }
  0x26   : > { %860 = vmatprep.mubr.bf16.mxu0 %v374_v44  ;;  %v4924_v6 = vld [vmem:[%s5290_s7 + $0x18] sm:$0xff]   ;;  %v395_v12 = vshll.u32 %v4925_v8, 16  ;;  %v5398_v24 = vld [vmem:[%s5290_s7 + $0xa4] ss:$0 sps:$4 sm:$0x11]   ;;  %v5420_v42 = vld [vmem:[%s5290_s7 + $0xa8] sm:$0xff]  }
  0x27   : > { %v381_v63 = vor.u32 %v380_v55, %v376_v49  ;;  %v388_v9 = vshrl.u32 %v4924_v6, 16  ;;  %v390_v11 = vshll.u32 %v4924_v6, 16  ;;  %v4931_v26 = vld [vmem:[%s6537_s1 + $0xe0] sm:$0xff]   ;;  %v612_v32 = vrot.slane %v5398_v24, 1  ;;  %v5427_v44 = vld [vmem:[%s5290_s7 + $0xb4] sm:$0xff]  }
  0x28   : > { %3927 = vmatpush3.bf16.msra.mxu0 %v4894_v14  ;;  %4482 = vmatpush3.bf16.msra.mxu1 %v5255_v13  ;;  %v5383_v14 = vld [vmem:[%s5290_s7 + $0x90] sm:$0xff]   ;;  %v4934_v36 = vld [vmem:[%s5290_s7 + $0x24] sm:$0xff]   ;;  %v4935_v38 = vld [vmem:[%s5290_s7 + $0x2c] ss:$0 sps:$4 sm:$0x11]   ;;  %v617_v50 = vrot.slane %v5427_v44, 1 }
  0x29   : > { %3928 = vmatprep.subr.bf16.mxu0 %v4895_v15  ;;  %4475 = vmatprep.subr.bf16.mxu1 %v5269_v16  ;;  %v386_v3 = vsel %vm362_vm1, %v381_v63, %v385_v56  ;;  %v5387_v15 = vld [vmem:[%s5290_s7 + $0x98] ss:$0 sps:$4 sm:$0x11]   ;;  %v402_v40 = vshll.u32 %v4934_v36, 16  ;;  %v407_v41 = vshll.u32 %v4935_v38, 16  ;;  %v4940_v48 = vld [vmem:[%s6537_s1 + $0x130] sm:$0xff]  }
  0x2a   : > { %v5435_v49 = vld [vmem:[%s5290_s7 + $0xbc] ss:$0 sps:$4 sm:$0x11]   ;;  %v4941_v51 = vld [vmem:[%s6537_s1 + $0xf0] sm:$0xff]  }
  0x2b   : > { %v618_v57 = vrot.slane %v5435_v49, 1  ;;  %v5457_v63 = vld [vmem:[%s5290_s7 + $0x38] ss:$0 sps:$4 sm:$0x11]  }
  0x2c   : > { %3929 = vmatpush3.bf16.msra.mxu0 %v4897_v17  ;;  %4483 = vmatpush3.bf16.msra.mxu1 %v5269_v16  ;;  %v5390_v17 = vld [vmem:[%s5290_s7 + $0x9c] sm:$0xff]  }
  0x2d   : > { %3930 = vmatprep.subr.bf16.mxu0 %v4898_v18  ;;  %4476 = vmatprep.subr.bf16.mxu1 %v5282_v19  ;;  %v392_v18 = vrot.slane %v390_v11, 1 }
  0x2f   : > { %v393_v27 = vor.u32 %v392_v18, %v388_v9 }
  0x30   : > { %3931 = vmatpush3.bf16.msra.mxu0 %v4900_v20  ;;  %4484 = vmatpush3.bf16.msra.mxu1 %v5282_v19  ;;  %v397_v20 = vrot.slane %v395_v12, 1 }
  0x31   : > { %3932 = vmatprep.subr.bf16.mxu0 %v4901_v21  ;;  %4477 = vmatprep.subr.bf16.mxu1 %v5298_v22  ;;  %v608_v21 = vrot.slane %v5383_v14, 1 }
  0x32   : > { %v398_v34 = vsel %vm362_vm1, %v393_v27, %v397_v20 }
  0x34   : > { %3933 = vmatpush3.bf16.msra.mxu0 %v4903_v25  ;;  %4485 = vmatpush3.bf16.msra.mxu1 %v5298_v22  ;;  %v611_v25 = vrot.slane %v5390_v17, 1 }
  0x35   : > { %4326 = vmatprep.subr.bf16.mxu0 %v5203_v1  ;;  %4054 = vmatprep.subr.bf16.mxu1 %v4910_v35  ;;  %v4933_v35 = vld [vmem:[%s6537_s1 + $0xe8] sm:$0xff]  }
  0x37   : > { %861 = vmatmul.mubr.bf16.vlgmr.msra.gmra.mrb[0].mxu0 %v4904_v23  ;;  %4359 = vmatmul.mubr.bf16.vlgmr.msra.gmra.mrb[0].mxu1 %v601_v45  ;;  %v609_v23 = vrot.slane %v5387_v15, 1  ;;  %v404_v45 = vrot.slane %v402_v40, 1 }
  0x38   : > { %4327 = vmatpush3.bf16.msra.mxu0 %v5203_v1  ;;  %4055 = vmatpush3.bf16.msra.mxu1 %v4911_v39  ;;  %v606_v1 = vrot.slane %v5361_v60, 1  ;;  %v400_v39 = vshrl.u32 %v4934_v36, 16 }
  0x39   : > { %4056 = vmatprep.subr.bf16.mxu1 %v4912_v43  ;;  %4328 = vmatprep.subr.bf16.mxu0 %v5216_v4  ;;  %v610_v28 = vsel %vm571_vm0, %v608_v21, %v609_v23  ;;  %v5424_v43 = vld [vmem:[%s5290_s7 + $0xb0] ss:$0 sps:$4 sm:$0x11]   ;;  %v4950_v23 = vld [vmem:[%s5290_s7 + $0x18] sm:$0xff]  }
  0x3a   : > { %4362 = vmatprep.mubr.bf16.mxu1 %v604_v0  ;;  %868 = vmatprep.mubr.bf16.mxu0 %v386_v3  ;;  %v405_v55 = vor.u32 %v404_v45, %v400_v39  ;;  %v4946_v3 = vld [vmem:[%s5290_s7 + $0xc] sm:$0xff]   ;;  %v5486_v39 = vld [vmem:[%s5290_s7 + $0x24] sm:$0xff]  }
  0x3b   : > { %v1376_v9 = vshrl.u32 %v4946_v3, 16  ;;  %v1378_v11 = vshll.u32 %v4946_v3, 16 }
  0x3c   : > { %4057 = vmatpush3.bf16.msra.mxu1 %v4913_v46  ;;  %4329 = vmatpush3.bf16.msra.mxu0 %v5216_v4  ;;  %v607_v4 = vsel %vm571_vm0, %v605_v61, %v606_v1  ;;  %v409_v46 = vrot.slane %v407_v41, 1  ;;  %v4943_v61 = vld [vmem:[%s6537_s1 + $0xf8] sm:$0xff]  }
  0x3d   : > { %4058 = vmatprep.subr.bf16.mxu1 %v4920_v58  ;;  %4330 = vmatprep.subr.bf16.mxu0 %v5228_v7  ;;  %v4942_v58 = vld [vmem:[%s6537_s1 + $0x138] sm:$0xff]  }
  0x3e   : > { %v410_v59 = vsel %vm362_vm1, %v405_v55, %v409_v46 }
  0x3f   : > { %869 = vmatmul.mubr.bf16.gmra.mrb[4].mxu0 %v4914_v47  ;;  %4363 = vmatmul.mubr.bf16.gmra.mrb[4].mxu1 %v607_v4  ;;  %v614_v47 = vrot.slane %v5420_v42, 1  ;;  %v4947_v4 = vld [vmem:[%s5290_s7 + $0x14] ss:$0 sps:$4 sm:$0x11]  }
  0x40   : > { %4059 = vmatpush3.bf16.msra.mxu1 %v4921_v62  ;;  %4331 = vmatpush3.bf16.msra.mxu0 %v5228_v7  ;;  %v4930_v7 = vld [vmem:[%s6537_s1 + $0x120] sm:$0xff]   ;;  %v5454_v62 = vld [vmem:[%s5290_s7 + $0x30] sm:$0xff]   ;;  %v1383_v12 = vshll.u32 %v4947_v4, 16  ;;  %v5505_v4 = vld [vmem:[%s5290_s7 + $0x5c] ss:$0 sps:$4 sm:$0x11]  }
  0x41   : > { %4060 = vmatprep.subr.bf16.mxu1 %v4922_v2  ;;  %4332 = vmatprep.subr.bf16.mxu0 %v5241_v10  ;;  %v412_v0 = vshrl.u32 %v5454_v62, 16  ;;  %v414_v1 = vshll.u32 %v5454_v62, 16  ;;  %v419_v2 = vshll.u32 %v5457_v63, 16 }
  0x42   : > { %4366 = vmatprep.mubr.bf16.mxu1 %v610_v28  ;;  %876 = vmatprep.mubr.bf16.mxu0 %v398_v34  ;;  %v4952_v28 = vld [vmem:[%s6537_s1 + $0x140] sm:$0xff]  }
  0x43   : > { %v421_v8 = vrot.slane %v419_v2, 1  ;;  %v4951_v34 = vld [vmem:[%s5290_s7 + $0x20] ss:$0 sps:$4 sm:$0x11]  }
  0x44   : > { %4061 = vmatpush3.bf16.msra.mxu1 %v4923_v5  ;;  %4333 = vmatpush3.bf16.msra.mxu0 %v5241_v10  ;;  %v613_v10 = vsel %vm571_vm0, %v611_v25, %v612_v32  ;;  %v5467_v5 = vld [vmem:[%s5290_s7 + $0x3c] sm:$0xff]   ;;  %v1385_v25 = vrot.slane %v1383_v12, 1  ;;  %v1395_v45 = vshll.u32 %v4951_v34, 16  ;;  %v462_v34 = vshll.u32 %v5308_v29, 16 }
  0x45   : > { %4062 = vmatprep.subr.bf16.mxu1 %v4930_v7  ;;  %4334 = vmatprep.subr.bf16.mxu0 %v5255_v13  ;;  %v424_v18 = vshrl.u32 %v5467_v5, 16  ;;  %v426_v20 = vshll.u32 %v5467_v5, 16  ;;  %v1380_v7 = vrot.slane %v1378_v11, 1  ;;  %v5510_v11 = vld [vmem:[%s5290_s7 + $0x30] sm:$0xff]  }
  0x47   : > { %877 = vmatmul.mubr.bf16.gmra.mrb[8].mxu0 %v4924_v6  ;;  %4367 = vmatmul.mubr.bf16.gmra.mrb[8].mxu1 %v613_v10  ;;  %v416_v6 = vrot.slane %v414_v1, 1  ;;  %v1388_v10 = vshrl.u32 %v4950_v23, 16 }
  0x48   : > { %4063 = vmatpush3.bf16.msra.mxu1 %v4931_v26  ;;  %4335 = vmatpush3.bf16.msra.mxu0 %v5255_v13  ;;  %v615_v13 = vrot.slane %v5424_v43, 1  ;;  %v428_v26 = vrot.slane %v426_v20, 1 }
  0x49   : > { %4064 = vmatprep.subr.bf16.mxu1 %v4932_v33  ;;  %4336 = vmatprep.subr.bf16.mxu0 %v5269_v16  ;;  %v417_v21 = vor.u32 %v416_v6, %v412_v0  ;;  %v1381_v33 = vor.u32 %v1380_v7, %v1376_v9  ;;  %v5516_v7 = vld [vmem:[%s5290_s7 + $0x38] ss:$0 sps:$4 sm:$0x11]  }
  0x4a   : > { %v616_v56 = vsel %vm571_vm0, %v614_v47, %v615_v13  ;;  %884 = vmatprep.mubr.bf16.mxu0 %v410_v59  ;;  %v5492_v47 = vld [vmem:[%s5290_s7 + $0x50] ss:$0 sps:$4 sm:$0x11]   ;;  %v1400_v59 = vshrl.u32 %v5486_v39, 16 }
  0x4b   : > { %4370 = vmatprep.mubr.bf16.mxu1 %v616_v56  ;;  %v422_v32 = vsel %vm362_vm1, %v417_v21, %v421_v8  ;;  %v1386_v40 = vsel %vm362_vm1, %v1381_v33, %v1385_v25  ;;  %v443_v55 = vshll.u32 %v5492_v47, 16  ;;  %v4956_v56 = vld [vmem:[%s5290_s7 + $0x2c] ss:$0 sps:$4 sm:$0x11]   ;;  %v455_v21 = vshll.u32 %v5505_v4, 16 }
  0x4c   : > { %4065 = vmatpush3.bf16.msra.mxu1 %v4933_v35  ;;  %4337 = vmatpush3.bf16.msra.mxu0 %v5269_v16  ;;  %v619_v16 = vsel %vm571_vm0, %v617_v50, %v618_v57  ;;  %v1390_v35 = vshll.u32 %v4950_v23, 16  ;;  %v1397_v50 = vrot.slane %v1395_v45, 1  ;;  %v1407_v1 = vshll.u32 %v4956_v56, 16 }
  0x4d   : > { %4066 = vmatprep.subr.bf16.mxu1 %v4940_v48  ;;  %4338 = vmatprep.subr.bf16.mxu0 %v5282_v19  ;;  %v445_v0 = vrot.slane %v443_v55, 1  ;;  %v1412_v25 = vshrl.u32 %v5510_v11, 16  ;;  %v457_v33 = vrot.slane %v455_v21, 1  ;;  %v4966_v55 = vld [vmem:[%s6537_s1 + $0x150] sm:$0xff]  }
  0x4e   : > { %v1392_v41 = vrot.slane %v1390_v35, 1  ;;  %v1409_v9 = vrot.slane %v1407_v1, 1  ;;  %v1419_v35 = vshll.u32 %v5516_v7, 16 }
  0x4f   : > { %885 = vmatmul.mubr.bf16.gmra.mrb[12].mxu0 %v4934_v36  ;;  %4371 = vmatmul.mubr.bf16.gmra.mrb[12].mxu1 %v619_v16  ;;  %v429_v36 = vor.u32 %v428_v26, %v424_v18  ;;  %v1402_v16 = vshll.u32 %v5486_v39, 16  ;;  %v1414_v26 = vshll.u32 %v5510_v11, 16 }
  0x50   : > { %4067 = vmatpush3.bf16.msra.mxu1 %v4941_v51  ;;  %4339 = vmatpush3.bf16.msra.mxu0 %v5282_v19  ;;  %v5470_v19 = vld [vmem:[%s5290_s7 + $0x44] ss:$0 sps:$4 sm:$0x11]   ;;  %v1393_v13 = vor.u32 %v1392_v41, %v1388_v10  ;;  %v1421_v41 = vrot.slane %v1419_v35, 1 }
  0x51   : > { %4068 = vmatprep.subr.bf16.mxu1 %v4942_v58  ;;  %4340 = vmatprep.subr.bf16.mxu0 %v5298_v22  ;;  %v431_v27 = vshll.u32 %v5470_v19, 16  ;;  %v1416_v10 = vrot.slane %v1414_v26, 1  ;;  %v5563_v26 = vld [vmem:[%s5290_s7 + $0x54] sm:$0xff]  }
  0x52   : > { %892 = vmatprep.mubr.bf16.mxu0 %v422_v32  ;;  %1872 = vmatprep.mubr.bf16.mxu1 %v1386_v40  ;;  %v1398_v57 = vsel %vm362_vm1, %v1393_v13, %v1397_v50  ;;  %v1450_v35 = vshll.u32 %v5563_v26, 16 }
  0x53   : > { %v433_v38 = vrot.slane %v431_v27, 1  ;;  %v4961_v27 = vld [vmem:[%s6537_s1 + $0x148] sm:$0xff]   ;;  %v1417_v40 = vor.u32 %v1416_v10, %v1412_v25 }
  0x54   : > { %4069 = vmatpush3.bf16.msra.mxu1 %v4943_v61  ;;  %4341 = vmatpush3.bf16.msra.mxu0 %v5298_v22  ;;  %v5483_v22 = vld [vmem:[%s5290_s7 + $0x48] sm:$0xff]   ;;  %v5502_v61 = vld [vmem:[%s5290_s7 + $0x54] sm:$0xff]  }
  0x55   : > { %4374 = vmatprep.subr.bf16.mxu1 %v4952_v28  ;;  %v434_v46 = vsel %vm362_vm1, %v429_v36, %v433_v38  ;;  %v436_v48 = vshrl.u32 %v5483_v22, 16  ;;  %v438_v51 = vshll.u32 %v5483_v22, 16  ;;  %v448_v6 = vshrl.u32 %v5502_v61, 16  ;;  %v5527_v36 = vld [vmem:[%s5290_s7 + $0x3c] sm:$0xff]  }
  0x56   : > { %v450_v8 = vshll.u32 %v5502_v61, 16  ;;  %v5530_v38 = vld [vmem:[%s5290_s7 + $0x44] ss:$0 sps:$4 sm:$0x11]   ;;  %v1426_v13 = vshll.u32 %v5527_v36, 16  ;;  %v1424_v50 = vshrl.u32 %v5527_v36, 16  ;;  %v1422_v56 = vsel %vm362_vm1, %v1417_v40, %v1421_v41 }
  0x57   : > { %893 = vmatmul.mubr.bf16.gmra.mrb[16].mxu0 %v5454_v62  ;;  %1873 = vmatmul.mubr.bf16.vlgmr.msra.gmra.mrb[16].mxu1 %v4946_v3  ;;  %v440_v58 = vrot.slane %v438_v51, 1  ;;  %v1404_v3 = vrot.slane %v1402_v16, 1  ;;  %v1431_v51 = vshll.u32 %v5530_v38, 16  ;;  %v474_v16 = vshll.u32 %v5315_v31, 16 }
  0x58   : > { %900 = vmatprep.mubr.bf16.mxu0 %v434_v46  ;;  %4375 = vmatpush3.bf16.msra.mxu1 %v4952_v28  ;;  %v452_v20 = vrot.slane %v450_v8, 1  ;;  %v464_v46 = vrot.slane %v462_v34, 1  ;;  %v484_v41 = vshrl.u32 %v5346_v52, 16 }
  0x59   : > { %1880 = vmatprep.mubr.bf16.mxu1 %v1398_v57  ;;  %v441_v2 = vor.u32 %v440_v58, %v436_v48  ;;  %v1405_v18 = vor.u32 %v1404_v3, %v1400_v59  ;;  %4376 = vmatprep.subr.bf16.mxu1 %v4961_v27  ;;  %v467_v48 = vshll.u32 %v5312_v30, 16  ;;  %v1428_v57 = vrot.slane %v1426_v13, 1  ;;  %v5544_v58 = vld [vmem:[%s5290_s7 + $0x48] sm:$0xff]   ;;  %v5582_v13 = vld [vmem:[%s5290_s7 + $0x60] sm:$0xff]  }
  0x5a   : > { %v453_v32 = vor.u32 %v452_v20, %v448_v6  ;;  %v1438_v3 = vshll.u32 %v5544_v58, 16  ;;  %v4971_v6 = vld [vmem:[%s6537_s1 + $0x158] sm:$0xff]  }
  0x5b   : > { %v446_v12 = vsel %vm362_vm1, %v441_v2, %v445_v0  ;;  %v1410_v28 = vsel %vm362_vm1, %v1405_v18, %v1409_v9  ;;  %v469_v59 = vrot.slane %v467_v48, 1  ;;  %v5549_v0 = vld [vmem:[%s5290_s7 + $0x50] ss:$0 sps:$4 sm:$0x11]   ;;  %v1429_v1 = vor.u32 %v1428_v57, %v1424_v50 }
  0x5c   : > { %4377 = vmatpush3.bf16.msra.mxu1 %v4961_v27  ;;  %v458_v45 = vsel %vm362_vm1, %v453_v32, %v457_v33  ;;  %v1433_v2 = vrot.slane %v1431_v51, 1  ;;  %v476_v9 = vrot.slane %v474_v16, 1  ;;  %v1436_v18 = vshrl.u32 %v5544_v58, 16  ;;  %v5568_v32 = vld [vmem:[%s5290_s7 + $0x5c] ss:$0 sps:$4 sm:$0x11]  }
  0x5d   : > { %4378 = vmatprep.subr.bf16.mxu1 %v4966_v55  ;;  %v1443_v20 = vshll.u32 %v5549_v0, 16  ;;  %v1440_v25 = vrot.slane %v1438_v3, 1  ;;  %v4976_v33 = vld [vmem:[%s6537_s1 + $0x160] sm:$0xff]   ;;  %v1455_v48 = vshll.u32 %v5568_v32, 16  ;;  %v1448_v51 = vshrl.u32 %v5563_v26, 16 }
  0x5e   : > { %v1434_v21 = vsel %vm362_vm1, %v1429_v1, %v1433_v2  ;;  %v498_v57 = vshll.u32 %v5353_v54, 16  ;;  %v5593_v16 = vld [vmem:[%s5290_s7 + $0x68] ss:$0 sps:$4 sm:$0x11]   ;;  %v1462_v1 = vshll.u32 %v5582_v13, 16  ;;  %v496_v2 = vshrl.u32 %v5353_v54, 16 }
  0x5f   : > { %901 = vmatmul.mubr.bf16.gmra.mrb[20].mxu0 %v5467_v5  ;;  %1881 = vmatmul.mubr.bf16.gmra.mrb[20].mxu1 %v4950_v23  ;;  %v460_v23 = vshrl.u32 %v5308_v29, 16  ;;  %v1441_v34 = vor.u32 %v1440_v25, %v1436_v18  ;;  %v1445_v10 = vrot.slane %v1443_v20, 1  ;;  %v510_v25 = vshll.u32 %v5383_v14, 16 }
  0x60   : > { %908 = vmatprep.mubr.bf16.mxu0 %v446_v12  ;;  %1888 = vmatprep.mubr.bf16.mxu1 %v1410_v28  ;;  %v479_v12 = vshll.u32 %v5324_v37, 16  ;;  %v486_v37 = vshll.u32 %v5346_v52, 16  ;;  %v1464_v20 = vrot.slane %v1462_v1, 1  ;;  %v532_v1 = vshrl.u32 %v5420_v42, 16 }
  0x61   : > { %v465_v30 = vor.u32 %v464_v46, %v460_v23  ;;  %4379 = vmatpush3.bf16.msra.mxu1 %v4966_v55  ;;  %v4981_v46 = vld [vmem:[%s6537_s1 + $0x168] sm:$0xff]   ;;  %v1446_v50 = vsel %vm362_vm1, %v1441_v34, %v1445_v10  ;;  %v1452_v55 = vrot.slane %v1450_v35, 1  ;;  %v512_v10 = vrot.slane %v510_v25, 1 }
  0x62   : > { %4380 = vmatprep.subr.bf16.mxu1 %v4971_v6  ;;  %v481_v28 = vrot.slane %v479_v12, 1  ;;  %v488_v23 = vrot.slane %v486_v37, 1  ;;  %v5604_v12 = vld [vmem:[%s5290_s7 + $0x74] ss:$0 sps:$4 sm:$0x11]   ;;  %v515_v37 = vshll.u32 %v5387_v15, 16 }
  0x63   : > { %v470_v8 = vsel %vm362_vm1, %v465_v30, %v469_v59  ;;  %v1457_v30 = vrot.slane %v1455_v48, 1  ;;  %v1453_v59 = vor.u32 %v1452_v55, %v1448_v51  ;;  %v1479_v35 = vshll.u32 %v5604_v12, 16 }
  0x64   : > { %v527_v51 = vshll.u32 %v5398_v24, 16  ;;  %v534_v25 = vshll.u32 %v5420_v42, 16 }
  0x65   : > { %4381 = vmatpush3.bf16.msra.mxu1 %v4971_v6  ;;  %v500_v6 = vrot.slane %v498_v57, 1  ;;  %v1458_v18 = vsel %vm362_vm1, %v1453_v59, %v1457_v30  ;;  %v5628_v57 = vld [vmem:[%s5290_s7 + $0x80] ss:$0 sps:$4 sm:$0x11]  }
  0x66   : > { %4382 = vmatprep.subr.bf16.mxu1 %v4976_v33  ;;  %v529_v24 = vrot.slane %v527_v51, 1 }
  0x67   : > { %909 = vmatmul.mubr.bf16.gmra.mrb[24].mxu0 %v5483_v22  ;;  %1889 = vmatmul.mubr.bf16.gmra.mrb[24].mxu1 %v5486_v39  ;;  %v472_v39 = vshrl.u32 %v5315_v31, 16 }
  0x68   : > { %916 = vmatprep.mubr.bf16.mxu0 %v458_v45  ;;  %1896 = vmatprep.mubr.bf16.mxu1 %v1422_v56  ;;  %v491_v45 = vshll.u32 %v5350_v53, 16  ;;  %v489_v53 = vor.u32 %v488_v23, %v484_v41  ;;  %v5618_v23 = vld [vmem:[%s5290_s7 + $0x78] sm:$0xff]  }
  0x69   : > { %v477_v27 = vor.u32 %v476_v9, %v472_v39  ;;  %4383 = vmatpush3.bf16.msra.mxu1 %v4976_v33  ;;  %v1460_v39 = vshrl.u32 %v5582_v13, 16  ;;  %v5601_v9 = vld [vmem:[%s5290_s7 + $0x6c] sm:$0xff]   ;;  %v1486_v30 = vshll.u32 %v5618_v23, 16 }
  0x6a   : > { %4384 = vmatprep.subr.bf16.mxu1 %v4981_v46  ;;  %v493_v56 = vrot.slane %v491_v45, 1  ;;  %v1474_v34 = vshll.u32 %v5601_v9, 16  ;;  %v1472_v41 = vshrl.u32 %v5601_v9, 16  ;;  %v517_v45 = vrot.slane %v515_v37, 1 }
  0x6b   : > { %v482_v40 = vsel %vm362_vm1, %v477_v27, %v481_v28  ;;  %v508_v28 = vshrl.u32 %v5383_v14, 16  ;;  %v1465_v33 = vor.u32 %v1464_v20, %v1460_v39  ;;  %v585_v39 = vrot.slane %v5457_v63, 1 }
  0x6c   : > { %v494_v3 = vsel %vm362_vm1, %v489_v53, %v493_v56  ;;  %v1476_v48 = vrot.slane %v1474_v34, 1  ;;  %v1481_v53 = vrot.slane %v1479_v35, 1  ;;  %v1484_v56 = vshrl.u32 %v5618_v23, 16 }
  0x6d   : > { %4385 = vmatpush3.bf16.msra.mxu1 %v4981_v46  ;;  %v522_v46 = vshll.u32 %v5390_v17, 16  ;;  %v513_v55 = vor.u32 %v512_v10, %v508_v28  ;;  %v588_v20 = vrot.slane %v5470_v19, 1  ;;  %v536_v10 = vrot.slane %v534_v25, 1 }
  0x6e   : > { %v1477_v59 = vor.u32 %v1476_v48, %v1472_v41  ;;  %v594_v41 = vrot.slane %v5505_v4, 1  ;;  %v5673_v48 = vld [vmem:[%s5290_s7 + $0x90] sm:$0xff]   ;;  %v5680_v4 = vld [vmem:[%s5290_s7 + $0x98] ss:$0 sps:$4 sm:$0x11]  }
  0x6f   : > { %917 = vmatmul.mubr.bf16.gmra.mrb[28].mxu0 %v5502_v61  ;;  %1897 = vmatmul.mubr.bf16.gmra.mrb[28].mxu1 %v5510_v11 }
  0x70   : > { %924 = vmatprep.mubr.bf16.mxu0 %v470_v8  ;;  %1904 = vmatprep.mubr.bf16.mxu1 %v1434_v21  ;;  %v503_v8 = vshll.u32 %v5361_v60, 16  ;;  %v1467_v21 = vshll.u32 %v5593_v16, 16  ;;  %v501_v60 = vor.u32 %v500_v6, %v496_v2  ;;  %v518_v2 = vsel %vm362_vm1, %v513_v55, %v517_v45 }
  0x71   : > { %v1491_v6 = vshll.u32 %v5628_v57, 16 }
  0x72   : > { %v505_v27 = vrot.slane %v503_v8, 1  ;;  %v584_v8 = vrot.slane %v5454_v62, 1 }
  0x74   : > { %v5649_v28 = vsel %vm571_vm0, %v584_v8, %v585_v39  ;;  %v1593_v8 = vrot.slane %v5516_v7, 1  ;;  %v1596_v7 = vrot.slane %v5530_v38, 1 }
  0x77   : > { %925 = vmatmul.mubr.bf16.gmra.mrb[32].mxu0 %v5308_v29  ;;  %1905 = vmatmul.mubr.bf16.gmra.mrb[32].mxu1 %v5527_v36  ;;  %v4984_v29 = vld [vmem:[%s6537_s1 + $0x1c0] sm:$0xff]  }
  0x78   : > { %932 = vmatprep.mubr.bf16.mxu0 %v482_v40  ;;  %1912 = vmatprep.mubr.bf16.mxu1 %v1446_v50  ;;  %v506_v40 = vsel %vm362_vm1, %v501_v60, %v505_v27  ;;  %v520_v50 = vshrl.u32 %v5390_v17, 16  ;;  %v539_v60 = vshll.u32 %v5424_v43, 16  ;;  %v5646_v27 = vld [vmem:[%s5290_s7 + $0x84] sm:$0xff]   ;;  %v1493_v43 = vrot.slane %v1491_v6, 1 }
  0x79   : > { %4190 = vmatprep.subr.bf16.mxu0 %v4984_v29  ;;  %v4992_v29 = vld [vmem:[%s6537_s1 + $0x170] sm:$0xff]   ;;  %v1498_v37 = vshll.u32 %v5646_v27, 16  ;;  %v1592_v6 = vrot.slane %v5510_v11, 1  ;;  %v1595_v11 = vrot.slane %v5527_v36, 1 }
  0x7a   : > { %4386 = vmatprep.subr.bf16.mxu1 %v4992_v29  ;;  %v541_v45 = vrot.slane %v539_v60, 1 }
  0x7b   : > { %4387 = vmatpush3.bf16.msra.mxu1 %v4992_v29  ;;  %v551_v29 = vshll.u32 %v5435_v49, 16  ;;  %v5701_v49 = vld [vmem:[%s6537_s1 + $0x200] sm:$0xff]  }
  0x7d   : > { %v553_v39 = vrot.slane %v551_v29, 1 }
  0x7f   : > { %933 = vmatmul.mubr.bf16.gmra.mrb[36].mxu0 %v5315_v31  ;;  %1913 = vmatmul.mubr.bf16.gmra.mrb[36].mxu1 %v5544_v58  ;;  %v1469_v31 = vrot.slane %v1467_v21, 1  ;;  %v1482_v21 = vsel %vm362_vm1, %v1477_v59, %v1481_v53  ;;  %v1510_v53 = vshll.u32 %v5673_v48, 16  ;;  %v1508_v59 = vshrl.u32 %v5673_v48, 16 }
  0x80   : > { %940 = vmatprep.mubr.bf16.mxu0 %v494_v3  ;;  %1920 = vmatprep.mubr.bf16.mxu1 %v1458_v18  ;;  %v1488_v3 = vrot.slane %v1486_v30, 1  ;;  %v587_v18 = vrot.slane %v5467_v5, 1  ;;  %v5656_v5 = vld [vmem:[%s5290_s7 + $0x8c] ss:$0 sps:$4 sm:$0x11]  }
  0x81   : > { %v1470_v15 = vsel %vm362_vm1, %v1465_v33, %v1469_v31  ;;  %v590_v33 = vrot.slane %v5483_v22, 1  ;;  %v591_v31 = vrot.slane %v5492_v47, 1  ;;  %v1503_v47 = vshll.u32 %v5656_v5, 16 }
  0x82   : > { %v5652_v63 = vsel %vm571_vm0, %v587_v18, %v588_v20  ;;  %v1489_v19 = vor.u32 %v1488_v3, %v1484_v56  ;;  %v544_v56 = vshrl.u32 %v5427_v44, 16  ;;  %v5694_v3 = vld [vmem:[%s5290_s7 + $0x9c] sm:$0xff]   ;;  %v5705_v18 = vld [vmem:[%s5290_s7 + $0xa4] ss:$0 sps:$4 sm:$0x11]   ;;  %v5708_v20 = vsel %vm571_vm0, %v1592_v6, %v1593_v8 }
  0x83   : > { %v5664_v35 = vsel %vm571_vm0, %v590_v33, %v591_v31  ;;  %v1505_v55 = vrot.slane %v1503_v47, 1  ;;  %v1522_v60 = vshll.u32 %v5694_v3, 16  ;;  %v1527_v36 = vshll.u32 %v5705_v18, 16 }
  0x84   : > { %v1494_v22 = vsel %vm362_vm1, %v1489_v19, %v1493_v43  ;;  %v1599_v19 = vrot.slane %v5549_v0, 1  ;;  %v1602_v33 = vrot.slane %v5568_v32, 1  ;;  %v1520_v0 = vshrl.u32 %v5694_v3, 16 }
  0x85   : > { %v1605_v32 = vrot.slane %v5593_v16, 1  ;;  %v1611_v16 = vrot.slane %v5628_v57, 1  ;;  %v1617_v8 = vrot.slane %v5680_v4, 1 }
  0x87   : > { %941 = vmatmul.mubr.bf16.gmra.mrb[40].mxu0 %v5346_v52  ;;  %1921 = vmatmul.mubr.bf16.gmra.mrb[40].mxu1 %v5563_v26  ;;  %v524_v52 = vrot.slane %v522_v46, 1  ;;  %v546_v46 = vshll.u32 %v5427_v44, 16 }
  0x88   : > { %948 = vmatprep.mubr.bf16.mxu0 %v506_v40  ;;  %1928 = vmatprep.mubr.bf16.mxu1 %v1470_v15  ;;  %v593_v40 = vrot.slane %v5502_v61, 1  ;;  %v1500_v15 = vrot.slane %v1498_v37, 1  ;;  %v537_v61 = vor.u32 %v536_v10, %v532_v1  ;;  %v1512_v1 = vrot.slane %v1510_v53, 1 }
  0x89   : > { %v525_v62 = vor.u32 %v524_v52, %v520_v50  ;;  %v548_v52 = vrot.slane %v546_v46, 1  ;;  %v1601_v37 = vrot.slane %v5563_v26, 1  ;;  %v1524_v10 = vrot.slane %v1522_v60, 1  ;;  %v5049_v26 = vld [vmem:[%s5290_s7 + $0x8] ss:$0 sps:$4 sm:$0x11]  }
  0x8a   : > { %v5676_v50 = vsel %vm571_vm0, %v593_v40, %v594_v41  ;;  %v542_v30 = vsel %vm362_vm1, %v537_v61, %v541_v45  ;;  %v5731_v40 = vld [vmem:[%s5290_s7 + $0xa8] sm:$0xff]   ;;  %v573_v41 = vrot.slane %v5049_v26, 1  ;;  %v1604_v46 = vrot.slane %v5582_v13, 1 }
  0x8b   : > { %v530_v34 = vsel %vm362_vm1, %v525_v62, %v529_v24  ;;  %v5715_v62 = vsel %vm571_vm0, %v1595_v11, %v1596_v7  ;;  %v5735_v45 = vsel %vm571_vm0, %v1601_v37, %v1602_v33  ;;  %v1608_v61 = vrot.slane %v5604_v12, 1 }
  0x8c   : > { %v5743_v47 = vsel %vm571_vm0, %v1604_v46, %v1605_v32  ;;  %v1613_v12 = vrot.slane %v5646_v27, 1  ;;  %v1619_v7 = vrot.slane %v5694_v3, 1  ;;  %v1620_v60 = vrot.slane %v5705_v18, 1  ;;  %v5800_v46 = vld [vmem:[%s5290_s7 + $0xc0] sm:$0xff]   ;;  %v4987_v32 = vld [vmem:[%s6537_s1 + $0x188] sm:$0xff]  }
  0x8f   : > { %949 = vmatmul.mubr.bf16.gmra.mrb[44].mxu0 %v5353_v54  ;;  %1929 = vmatmul.mubr.bf16.gmra.mrb[44].mxu1 %v5582_v13  ;;  %v1496_v54 = vshrl.u32 %v5646_v27, 16  ;;  %v1610_v13 = vrot.slane %v5618_v23, 1 }
  0x90   : > { %956 = vmatprep.mubr.bf16.mxu0 %v518_v2  ;;  %1936 = vmatprep.mubr.bf16.mxu1 %v1482_v21  ;;  %v1515_v2 = vshll.u32 %v5680_v4, 16  ;;  %v1513_v21 = vor.u32 %v1512_v1, %v1508_v59  ;;  %v4996_v59 = vld [vmem:[%s5290_s7 + $0xbc] ss:$0 sps:$4 sm:$0x11]   ;;  %v5050_v1 = vld [vmem:[%s5290_s7 + $0xc] sm:$0xff]   ;;  %v4985_v4 = vld [vmem:[%s6537_s1 + $0x180] sm:$0xff]  }
  0x91   : > { %v1501_v51 = vor.u32 %v1500_v15, %v1496_v54  ;;  %v1598_v54 = vrot.slane %v5544_v58, 1  ;;  %v1529_v15 = vrot.slane %v1527_v36, 1  ;;  %v4986_v36 = vld [vmem:[%s6537_s1 + $0x1c8] sm:$0xff]   ;;  %v1551_v33 = vshll.u32 %v4996_v59, 16 }
  0x92   : > { %v1517_v25 = vrot.slane %v1515_v2, 1  ;;  %v575_v2 = vrot.slane %v5050_v1, 1  ;;  %v1626_v26 = vrot.slane %v4996_v59, 1  ;;  %v1558_v59 = vshll.u32 %v5800_v46, 16  ;;  %v5828_v1 = vld [vmem:[%s5290_s7 + $0x24] sm:$0xff]  }
  0x93   : > { %v1506_v24 = vsel %vm362_vm1, %v1501_v51, %v1505_v55  ;;  %v5723_v38 = vsel %vm571_vm0, %v1598_v54, %v1599_v19  ;;  %v1534_v51 = vshll.u32 %v5731_v40, 16  ;;  %v1532_v55 = vshrl.u32 %v5731_v40, 16 }
  0x94   : > { %v1518_v31 = vsel %vm362_vm1, %v1513_v21, %v1517_v25  ;;  %v1622_v19 = vrot.slane %v5731_v40, 1 }
  0x95   : > { %v1536_v29 = vrot.slane %v1534_v51, 1 }
  0x97   : > { %957 = vmatmul.mubr.bf16.gmra.mrb[48].mxu0 %v5383_v14  ;;  %1937 = vmatmul.mubr.bf16.gmra.mrb[48].mxu1 %v5601_v9  ;;  %v5005_v14 = vld [vmem:[%s6537_s1 + $0x178] sm:$0xff]  }
  0x98   : > { %964 = vmatprep.mubr.bf16.mxu0 %v530_v34  ;;  %1944 = vmatprep.mubr.bf16.mxu1 %v1494_v22  ;;  %v5048_v34 = vld [vmem:[%s5290_s7] sm:$0xff]   ;;  %v1607_v22 = vrot.slane %v5601_v9, 1 }
  0x99   : > { %4388 = vmatprep.subr.bf16.mxu1 %v5005_v14  ;;  %v572_v58 = vrot.slane %v5048_v34, 1  ;;  %v5792_v34 = vsel %vm571_vm0, %v1619_v7, %v1620_v60  ;;  %v1560_v7 = vrot.slane %v1558_v59, 1  ;;  %v5058_v59 = vld [vmem:[%s5290_s7 + $0x18] sm:$0xff]  }
  0x9a   : > { %4389 = vmatpush3.bf16.msra.mxu1 %v5005_v14  ;;  %v1525_v14 = vor.u32 %v1524_v10, %v1520_v0  ;;  %v5751_v9 = vsel %vm571_vm0, %v1607_v22, %v1608_v61  ;;  %v5054_v22 = vld [vmem:[%s5290_s7 + $0x24] sm:$0xff]   ;;  %v5055_v61 = vld [vmem:[%s5290_s7 + $0x2c] ss:$0 sps:$4 sm:$0x11]  }
  0x9b   : > { %4422 = vmatprep.subr.bf16.mxu1 %v5701_v49  ;;  %v574_v53 = vsel %vm571_vm0, %v572_v58, %v573_v41 }
  0x9c   : > { %v1530_v57 = vsel %vm362_vm1, %v1525_v14, %v1529_v15  ;;  %v581_v15 = vrot.slane %v5054_v22, 1  ;;  %v582_v14 = vrot.slane %v5055_v61, 1 }
  0x9f   : > { %965 = vmatmul.mubr.bf16.gmra.mrb[52].mxu0 %v5390_v17  ;;  %1945 = vmatmul.mubr.bf16.gmra.mrb[52].mxu1 %v5618_v23  ;;  %v549_v17 = vor.u32 %v548_v52, %v544_v56  ;;  %v5755_v56 = vsel %vm571_vm0, %v1610_v13, %v1611_v16  ;;  %v5760_v52 = vld [vmem:[%s5290_s7 + $0xb4] sm:$0xff]   ;;  %v1553_v16 = vrot.slane %v1551_v33, 1 }
  0xa0   : > { %972 = vmatprep.mubr.bf16.mxu0 %v542_v30  ;;  %1952 = vmatprep.mubr.bf16.mxu1 %v1506_v24  ;;  %v1614_v30 = vrot.slane %v5656_v5, 1  ;;  %v1616_v5 = vrot.slane %v5673_v48, 1  ;;  %v1546_v21 = vshll.u32 %v5760_v52, 16  ;;  %v1544_v18 = vshrl.u32 %v5760_v52, 16  ;;  %v4990_v13 = vld [vmem:[%s6537_s1 + $0x1d0] sm:$0xff]  }
  0xa1   : > { %v554_v43 = vsel %vm362_vm1, %v549_v17, %v553_v39  ;;  %v5052_v17 = vld [vmem:[%s5290_s7 + $0x18] sm:$0xff]   ;;  %v5053_v39 = vld [vmem:[%s5290_s7 + $0x20] ss:$0 sps:$4 sm:$0x11]   ;;  %v1625_v10 = vrot.slane %v5760_v52, 1 }
  0xa2   : > { %v5766_v24 = vsel %vm571_vm0, %v1613_v12, %v1614_v30  ;;  %v579_v11 = vrot.slane %v5053_v39, 1  ;;  %v5778_v25 = vsel %vm571_vm0, %v1616_v5, %v1617_v8  ;;  %v1548_v41 = vrot.slane %v1546_v21, 1  ;;  %v5818_v30 = vld [vmem:[%s5290_s7 + $0x18] sm:$0xff]  }
  0xa3   : > { %v5809_v51 = vsel %vm571_vm0, %v1625_v10, %v1626_v26  ;;  %v2662_v8 = vrot.slane %v5828_v1, 1 }
  0xa7   : > { %973 = vmatmul.mubr.bf16.gmra.mrb[56].mxu0 %v5420_v42  ;;  %1953 = vmatmul.mubr.bf16.gmra.mrb[56].mxu1 %v5646_v27  ;;  %v4989_v42 = vld [vmem:[%s5290_s7 + $0xb0] ss:$0 sps:$4 sm:$0x11]   ;;  %v5051_v27 = vld [vmem:[%s5290_s7 + $0x14] ss:$0 sps:$4 sm:$0x11]  }
  0xa8   : > { %980 = vmatprep.mubr.bf16.mxu0 %v554_v43  ;;  %1960 = vmatprep.mubr.bf16.mxu1 %v1518_v31  ;;  %v1539_v23 = vshll.u32 %v4989_v42, 16  ;;  %v576_v6 = vrot.slane %v5051_v27, 1  ;;  %v1623_v43 = vrot.slane %v4989_v42, 1  ;;  %v5002_v31 = vld [vmem:[%s5290_s7 + $0xc8] ss:$0 sps:$4 sm:$0x11]  }
  0xa9   : > { %v1629_v12 = vrot.slane %v5002_v31, 1  ;;  %v4993_v27 = vld [vmem:[%s6537_s1 + $0x1d8] sm:$0xff]   ;;  %v1563_v21 = vshll.u32 %v5002_v31, 16  ;;  %v5000_v31 = vld [vmem:[%s6537_s1 + $0x1a8] sm:$0xff]  }
  0xaa   : > { %v1541_v54 = vrot.slane %v1539_v23, 1  ;;  %v577_v37 = vsel %vm571_vm0, %v575_v2, %v576_v6  ;;  %v5796_v0 = vsel %vm571_vm0, %v1622_v19, %v1623_v43  ;;  %v5821_v23 = vld [vmem:[%s5290_s7 + $0x2c] ss:$0 sps:$4 sm:$0x11]   ;;  %v583_v2 = vsel %vm571_vm0, %v581_v15, %v582_v14 }
  0xab   : > { %v2659_v6 = vrot.slane %v5818_v30, 1  ;;  %v1565_v43 = vrot.slane %v1563_v21, 1  ;;  %v2464_v15 = vshrl.u32 %v5828_v1, 16  ;;  %v2471_v61 = vshll.u32 %v5821_v23, 16  ;;  %v5907_v21 = vld [vmem:[%s5290_s7 + $0x3c] sm:$0xff]  }
  0xaf   : > { %981 = vmatmul.mubr.bf16.gmra.mrb[60].mxu0 %v5427_v44  ;;  %1961 = vmatmul.mubr.bf16.gmra.mrb[60].mxu1 %v5673_v48  ;;  %v578_v44 = vrot.slane %v5052_v17, 1  ;;  %v1537_v48 = vor.u32 %v1536_v29, %v1532_v55  ;;  %v5009_v55 = vld [vmem:[%s5290_s7 + $0x20] ss:$0 sps:$4 sm:$0x11]   ;;  %v2663_v17 = vrot.slane %v5821_v23, 1 }
  0xb0   : > { %4342 = vmatprep.mubr.bf16.mxu0 %v574_v53  ;;  %1968 = vmatprep.mubr.bf16.mxu1 %v1530_v57  ;;  %v1628_v53 = vrot.slane %v5800_v46, 1  ;;  %v1549_v57 = vor.u32 %v1548_v41, %v1544_v18  ;;  %v2660_v5 = vrot.slane %v5009_v55, 1  ;;  %v2459_v18 = vshll.u32 %v5009_v55, 16  ;;  %v5056_v41 = vld [vmem:[%s5290_s7 + $0xc] sm:$0xff]  }
  0xb1   : > { %v580_v58 = vsel %vm571_vm0, %v578_v44, %v579_v11  ;;  %v1542_v42 = vsel %vm362_vm1, %v1537_v48, %v1541_v54  ;;  %v1556_v11 = vshrl.u32 %v5800_v46, 16  ;;  %v5846_v60 = vsel %vm571_vm0, %v2662_v8, %v2663_v17  ;;  %v4997_v48 = vld [vmem:[%s6537_s1 + $0x1e0] sm:$0xff]   ;;  %v5061_v8 = vld [vmem:[%s5290_s7 + $0x2c] ss:$0 sps:$4 sm:$0x11]  }
  0xb2   : > { %v5824_v29 = vsel %vm571_vm0, %v1628_v53, %v1629_v12  ;;  %v1554_v44 = vsel %vm362_vm1, %v1549_v57, %v1553_v16  ;;  %v5842_v39 = vsel %vm571_vm0, %v2659_v6, %v2660_v5  ;;  %v2454_v54 = vshll.u32 %v5818_v30, 16  ;;  %v5887_v16 = vld [vmem:[%s5290_s7 + $0x30] sm:$0xff]   ;;  %v5007_v53 = vld [vmem:[%s6537_s1 + $0x1b8] sm:$0xff]   ;;  %v5060_v6 = vld [vmem:[%s5290_s7 + $0x24] sm:$0xff]  }
  0xb3   : > { %v1561_v19 = vor.u32 %v1560_v7, %v1556_v11  ;;  %v2461_v26 = vrot.slane %v2459_v18, 1  ;;  %v2473_v12 = vrot.slane %v2471_v61, 1  ;;  %v5896_v57 = vld [vmem:[%s5290_s7 + $0x38] ss:$0 sps:$4 sm:$0x11]   ;;  %v1589_v5 = vrot.slane %v5060_v6, 1 }
  0xb4   : > { %v1590_v17 = vrot.slane %v5061_v8, 1  ;;  %v2483_v7 = vshll.u32 %v5896_v57, 16 }
  0xb5   : > { %v1566_v33 = vsel %vm362_vm1, %v1561_v19, %v1565_v43 }
  0xb6   : > { %v2485_v43 = vrot.slane %v2483_v7, 1 }
  0xb7   : > { %4343 = vmatmul.mubr.bf16.vlgmr.msra.gmra.mrb[64].mxu0 %v577_v37  ;;  %1969 = vmatmul.mubr.bf16.gmra.mrb[64].mxu1 %v5694_v3  ;;  %v4991_v3 = vld [vmem:[%s6537_s1 + $0x190] sm:$0xff]   ;;  %v4998_v37 = vld [vmem:[%s6537_s1 + $0x1a0] sm:$0xff]  }
  0xb8   : > { %4191 = vmatpush3.bf16.msra.mxu0 %v4985_v4  ;;  %4346 = vmatprep.mubr.bf16.mxu0 %v580_v58  ;;  %v4994_v4 = vld [vmem:[%s6537_s1 + $0x198] sm:$0xff]   ;;  %v5003_v58 = vld [vmem:[%s6537_s1 + $0x1f0] sm:$0xff]  }
  0xb9   : > { %4192 = vmatprep.subr.bf16.mxu0 %v4986_v36  ;;  %1976 = vmatprep.mubr.bf16.mxu1 %v1542_v42  ;;  %v2456_v36 = vrot.slane %v2454_v54, 1  ;;  %v5057_v42 = vld [vmem:[%s5290_s7 + $0x14] ss:$0 sps:$4 sm:$0x11]   ;;  %v5015_v54 = vld [vmem:[%s6537_s1 + $0x208] sm:$0xff]  }
  0xba   : > { %v1584_v22 = vrot.slane %v5057_v42, 1 }
  0xbc   : > { %4193 = vmatpush3.bf16.msra.mxu0 %v4987_v32  ;;  %v1583_v32 = vrot.slane %v5056_v41, 1 }
  0xbd   : > { %4194 = vmatprep.subr.bf16.mxu0 %v4990_v13 }
  0xbe   : > { %v1585_v55 = vsel %vm571_vm0, %v1583_v32, %v1584_v22  ;;  %v5946_v22 = vld [vmem:[%s5290_s7 + $0x54] sm:$0xff]  }
  0xbf   : > { %4347 = vmatmul.mubr.bf16.gmra.mrb[68].mxu0 %v583_v2  ;;  %1977 = vmatmul.mubr.bf16.gmra.mrb[68].mxu1 %v5731_v40  ;;  %v2452_v40 = vshrl.u32 %v5818_v30, 16  ;;  %v1586_v2 = vrot.slane %v5058_v59, 1  ;;  %v2514_v61 = vshll.u32 %v5946_v22, 16  ;;  %v5973_v59 = vld [vmem:[%s5290_s7 + $0x68] ss:$0 sps:$4 sm:$0x11]  }
  0xc0   : > { %4195 = vmatpush3.bf16.msra.mxu0 %v4991_v3  ;;  %4350 = vmatprep.mubr.bf16.mxu0 %v5649_v28  ;;  %v4999_v28 = vld [vmem:[%s6537_s1 + $0x1e8] sm:$0xff]   ;;  %v5059_v3 = vld [vmem:[%s5290_s7 + $0x20] ss:$0 sps:$4 sm:$0x11]  }
  0xc1   : > { %4196 = vmatprep.subr.bf16.mxu0 %v4993_v27  ;;  %1984 = vmatprep.mubr.bf16.mxu1 %v1554_v44  ;;  %v2457_v10 = vor.u32 %v2456_v36, %v2452_v40  ;;  %v1587_v27 = vrot.slane %v5059_v3, 1  ;;  %v2476_v44 = vshrl.u32 %v5887_v16, 16  ;;  %v2488_v36 = vshrl.u32 %v5907_v21, 16 }
  0xc3   : > { %v2462_v14 = vsel %vm362_vm1, %v2457_v10, %v2461_v26  ;;  %v5935_v26 = vld [vmem:[%s5290_s7 + $0x50] ss:$0 sps:$4 sm:$0x11]  }
  0xc4   : > { %4197 = vmatpush3.bf16.msra.mxu0 %v4994_v4  ;;  %v1588_v4 = vsel %vm571_vm0, %v1586_v2, %v1587_v27  ;;  %v2507_v42 = vshll.u32 %v5935_v26, 16 }
  0xc5   : > { %4198 = vmatprep.subr.bf16.mxu0 %v4997_v48  ;;  %v1591_v48 = vsel %vm571_vm0, %v1589_v5, %v1590_v17  ;;  %v2531_v5 = vshll.u32 %v5973_v59, 16  ;;  %v5986_v17 = vld [vmem:[%s5290_s7 + $0x74] ss:$0 sps:$4 sm:$0x11]  }
  0xc7   : > { %4351 = vmatmul.mubr.bf16.gmra.mrb[72].mxu0 %v5652_v63  ;;  %1985 = vmatmul.mubr.bf16.gmra.mrb[72].mxu1 %v5760_v52  ;;  %v2466_v63 = vshll.u32 %v5828_v1, 16  ;;  %v5006_v52 = vld [vmem:[%s6537_s1 + $0x1f8] sm:$0xff]   ;;  %v2533_v8 = vrot.slane %v2531_v5, 1 }
  0xc8   : > { %4199 = vmatpush3.bf16.msra.mxu0 %v4998_v37  ;;  %4354 = vmatprep.mubr.bf16.mxu0 %v5664_v35  ;;  %v5004_v35 = vld [vmem:[%s6537_s1 + $0x1b0] sm:$0xff]   ;;  %v5916_v37 = vld [vmem:[%s5290_s7 + $0x44] ss:$0 sps:$4 sm:$0x11]  }
  0xc9   : > { %4200 = vmatprep.subr.bf16.mxu0 %v4999_v28  ;;  %1992 = vmatprep.mubr.bf16.mxu1 %v1566_v33  ;;  %v2468_v13 = vrot.slane %v2466_v63, 1  ;;  %v2490_v28 = vshll.u32 %v5907_v21, 16  ;;  %v2495_v33 = vshll.u32 %v5916_v37, 16 }
  0xcb   : > { %v2469_v23 = vor.u32 %v2468_v13, %v2464_v15  ;;  %v2492_v18 = vrot.slane %v2490_v28, 1  ;;  %v2497_v10 = vrot.slane %v2495_v33, 1  ;;  %v5954_v15 = vld [vmem:[%s5290_s7 + $0x5c] ss:$0 sps:$4 sm:$0x11]  }
  0xcc   : > { %4201 = vmatpush3.bf16.msra.mxu0 %v5000_v31  ;;  %v5927_v31 = vld [vmem:[%s5290_s7 + $0x48] sm:$0xff]  }
  0xcd   : > { %4202 = vmatprep.subr.bf16.mxu0 %v5003_v58  ;;  %v2493_v58 = vor.u32 %v2492_v18, %v2488_v36  ;;  %v2502_v63 = vshll.u32 %v5927_v31, 16  ;;  %v2500_v32 = vshrl.u32 %v5927_v31, 16 }
  0xcf   : > { %4355 = vmatmul.mubr.bf16.gmra.mrb[76].mxu0 %v5676_v50  ;;  %1993 = vmatmul.mubr.bf16.gmra.mrb[76].mxu1 %v5800_v46  ;;  %v2478_v50 = vshll.u32 %v5887_v16, 16  ;;  %v2474_v46 = vsel %vm362_vm1, %v2469_v23, %v2473_v12  ;;  %v2498_v41 = vsel %vm362_vm1, %v2493_v58, %v2497_v10  ;;  %v5965_v12 = vld [vmem:[%s5290_s7 + $0x60] sm:$0xff]  }
  0xd0   : > { %4203 = vmatpush3.bf16.msra.mxu0 %v5004_v35  ;;  %2948 = vmatprep.mubr.bf16.mxu0 %v2462_v14  ;;  %v5030_v14 = vld [vmem:[%s6537_s1 + $0x230] sm:$0xff]   ;;  %v2526_v2 = vshll.u32 %v5965_v12, 16  ;;  %v2524_v27 = vshrl.u32 %v5965_v12, 16  ;;  %v6009_v58 = vld [vmem:[%s5290_s7 + $0x84] sm:$0xff]  }
  0xd1   : > { %4204 = vmatprep.subr.bf16.mxu0 %v5006_v52  ;;  %4390 = vmatprep.mubr.bf16.mxu1 %v1585_v55  ;;  %v2480_v11 = vrot.slane %v2478_v50, 1  ;;  %v2509_v52 = vrot.slane %v2507_v42, 1  ;;  %v2512_v55 = vshrl.u32 %v5946_v22, 16 }
  0xd2   : > { %v2528_v6 = vrot.slane %v2526_v2, 1 }
  0xd3   : > { %v2481_v19 = vor.u32 %v2480_v11, %v2476_v44 }
  0xd4   : > { %4205 = vmatpush3.bf16.msra.mxu0 %v5007_v53  ;;  %v2519_v53 = vshll.u32 %v5954_v15, 16 }
  0xd5   : > { %v2486_v40 = vsel %vm362_vm1, %v2481_v19, %v2485_v43  ;;  %v5999_v19 = vld [vmem:[%s5290_s7 + $0x80] ss:$0 sps:$4 sm:$0x11]  }
  0xd6   : > { %v2521_v50 = vrot.slane %v2519_v53, 1  ;;  %v6033_v53 = vld [vmem:[%s5290_s7 + $0x98] ss:$0 sps:$4 sm:$0x11]  }
  0xd7   : > { %2949 = vmatmul.mubr.bf16.vlgmr.msra.gmra.mrb[80].mxu0 %v5818_v30  ;;  %4391 = vmatmul.mubr.bf16.vlgmr.msra.gmra.mrb[80].mxu1 %v1588_v4  ;;  %v5018_v30 = vld [vmem:[%s6537_s1 + $0x210] sm:$0xff]   ;;  %v2543_v4 = vshll.u32 %v5986_v17, 16 }
  0xd8   : > { %2956 = vmatprep.mubr.bf16.mxu0 %v2474_v46  ;;  %4394 = vmatprep.mubr.bf16.mxu1 %v1591_v48  ;;  %v5994_v48 = vld [vmem:[%s5290_s7 + $0x78] sm:$0xff]  }
  0xd9   : > { %4423 = vmatpush3.bf16.msra.mxu1 %v5701_v49  ;;  %v5021_v49 = vld [vmem:[%s6537_s1 + $0x218] sm:$0xff]   ;;  %v2548_v33 = vshrl.u32 %v5994_v48, 16 }
  0xda   : > { %4424 = vmatprep.subr.bf16.mxu1 %v5015_v54 }
  0xdd   : > { %4425 = vmatpush3.bf16.msra.mxu1 %v5015_v54  ;;  %v2545_v54 = vrot.slane %v2543_v4, 1 }
  0xde   : > { %4426 = vmatprep.subr.bf16.mxu1 %v5018_v30 }
  0xdf   : > { %2957 = vmatmul.mubr.bf16.gmra.mrb[84].mxu0 %v5828_v1  ;;  %4395 = vmatmul.mubr.bf16.gmra.mrb[84].mxu1 %v5708_v20  ;;  %v5024_v1 = vld [vmem:[%s6537_s1 + $0x220] sm:$0xff]   ;;  %v2504_v20 = vrot.slane %v2502_v63, 1 }
  0xe0   : > { %2964 = vmatprep.mubr.bf16.mxu0 %v2486_v40  ;;  %4398 = vmatprep.mubr.bf16.mxu1 %v5715_v62  ;;  %v5027_v62 = vld [vmem:[%s6537_s1 + $0x228] sm:$0xff]  }
  0xe1   : > { %4427 = vmatpush3.bf16.msra.mxu1 %v5018_v30  ;;  %v2505_v35 = vor.u32 %v2504_v20, %v2500_v32 }
  0xe2   : > { %4428 = vmatprep.subr.bf16.mxu1 %v5021_v49 }
  0xe3   : > { %v2510_v13 = vsel %vm362_vm1, %v2505_v35, %v2509_v52 }
  0xe5   : > { %4429 = vmatpush3.bf16.msra.mxu1 %v5021_v49  ;;  %v2555_v49 = vshll.u32 %v5999_v19, 16 }
  0xe6   : > { %4430 = vmatprep.subr.bf16.mxu1 %v5024_v1 }
  0xe7   : > { %2965 = vmatmul.mubr.bf16.gmra.mrb[88].mxu0 %v5887_v16  ;;  %4399 = vmatmul.mubr.bf16.gmra.mrb[88].mxu1 %v5723_v38  ;;  %v2516_v38 = vrot.slane %v2514_v61, 1  ;;  %v2557_v63 = vrot.slane %v2555_v49, 1  ;;  %v6024_v61 = vld [vmem:[%s5290_s7 + $0x90] sm:$0xff]  }
  0xe8   : > { %2972 = vmatprep.mubr.bf16.mxu0 %v2498_v41  ;;  %4402 = vmatprep.mubr.bf16.mxu1 %v5735_v45  ;;  %v5031_v45 = vld [vmem:[%s6537_s1 + $0x238] sm:$0xff]   ;;  %v2562_v41 = vshll.u32 %v6009_v58, 16  ;;  %v6070_v49 = vld [vmem:[%s5290_s7 + $0xb0] ss:$0 sps:$4 sm:$0x11]  }
  0xe9   : > { %4431 = vmatpush3.bf16.msra.mxu1 %v5024_v1  ;;  %v2517_v23 = vor.u32 %v2516_v38, %v2512_v55  ;;  %v6016_v1 = vld [vmem:[%s5290_s7 + $0x8c] ss:$0 sps:$4 sm:$0x11]  }
  0xea   : > { %4432 = vmatprep.subr.bf16.mxu1 %v5027_v62  ;;  %v2564_v35 = vrot.slane %v2562_v41, 1  ;;  %v2567_v52 = vshll.u32 %v6016_v1, 16 }
  0xeb   : > { %v2522_v3 = vsel %vm362_vm1, %v2517_v23, %v2521_v50  ;;  %v2665_v23 = vrot.slane %v5887_v16, 1  ;;  %v2666_v50 = vrot.slane %v5896_v57, 1 }
  0xec   : > { %v2569_v38 = vrot.slane %v2567_v52, 1 }
  0xed   : > { %4433 = vmatpush3.bf16.msra.mxu1 %v5027_v62  ;;  %v2560_v62 = vshrl.u32 %v6009_v58, 16 }
  0xee   : > { %4434 = vmatprep.subr.bf16.mxu1 %v5030_v14 }
  0xef   : > { %2973 = vmatmul.mubr.bf16.gmra.mrb[92].mxu0 %v5907_v21  ;;  %4403 = vmatmul.mubr.bf16.gmra.mrb[92].mxu1 %v5743_v47  ;;  %v5981_v47 = vld [vmem:[%s5290_s7 + $0x6c] sm:$0xff]   ;;  %v2565_v55 = vor.u32 %v2564_v35, %v2560_v62  ;;  %v2677_v62 = vrot.slane %v5965_v12, 1  ;;  %v2678_v35 = vrot.slane %v5973_v59, 1 }
  0xf0   : > { %2980 = vmatprep.mubr.bf16.mxu0 %v2510_v13  ;;  %4406 = vmatprep.mubr.bf16.mxu1 %v5751_v9  ;;  %v2529_v9 = vor.u32 %v2528_v6, %v2524_v27  ;;  %v2538_v46 = vshll.u32 %v5981_v47, 16  ;;  %v2536_v11 = vshrl.u32 %v5981_v47, 16  ;;  %v6043_v6 = vld [vmem:[%s5290_s7 + $0x9c] sm:$0xff]  }
  0xf1   : > { %4435 = vmatpush3.bf16.msra.mxu1 %v5030_v14  ;;  %v2570_v2 = vsel %vm362_vm1, %v2565_v55, %v2569_v38  ;;  %v2603_v38 = vshll.u32 %v6070_v49, 16 }
  0xf2   : > { %4436 = vmatprep.subr.bf16.mxu1 %v5031_v45  ;;  %v2534_v44 = vsel %vm362_vm1, %v2529_v9, %v2533_v8  ;;  %v2540_v7 = vrot.slane %v2538_v46, 1 }
  0xf3   : > { %v2605_v59 = vrot.slane %v2603_v38, 1 }
  0xf5   : > { %4437 = vmatpush3.bf16.msra.mxu1 %v5031_v45  ;;  %v2574_v45 = vshll.u32 %v6024_v61, 16 }
  0xf7   : > { %2981 = vmatmul.mubr.bf16.gmra.mrb[96].mxu0 %v5927_v31  ;;  %4407 = vmatmul.mubr.bf16.gmra.mrb[0].mxu1 %v5755_v56  ;;  %v2541_v56 = vor.u32 %v2540_v7, %v2536_v11  ;;  %v2576_v27 = vrot.slane %v2574_v45, 1  ;;  %v6051_v11 = vld [vmem:[%s5290_s7 + $0xa4] ss:$0 sps:$4 sm:$0x11]   ;;  %v2586_v7 = vshll.u32 %v6043_v6, 16  ;;  %v6085_v45 = vld [vmem:[%s5290_s7 + $0xb4] sm:$0xff]  }
  0xf8   : > { %2988 = vmatprep.mubr.bf16.mxu0 %v2522_v3  ;;  %4410 = vmatprep.mubr.bf16.mxu1 %v5766_v24  ;;  %v2550_v24 = vshll.u32 %v5994_v48, 16  ;;  %v2572_v3 = vshrl.u32 %v6024_v61, 16 }
  0xf9   : > { %v2546_v18 = vsel %vm362_vm1, %v2541_v56, %v2545_v54  ;;  %v2668_v56 = vrot.slane %v5907_v21, 1  ;;  %v2669_v54 = vrot.slane %v5916_v37, 1 }
  0xfa   : > { %v2577_v46 = vor.u32 %v2576_v27, %v2572_v3  ;;  %v2680_v3 = vrot.slane %v5981_v47, 1  ;;  %v2681_v27 = vrot.slane %v5986_v17, 1  ;;  %v6104_v17 = vld [vmem:[%s5290_s7 + $0xc0] sm:$0xff]  }
  0xff   : > { %2989 = vmatmul.mubr.bf16.gmra.mrb[100].mxu0 %v5946_v22  ;;  %4411 = vmatmul.mubr.bf16.gmra.mrb[4].mxu1 %v5778_v25  ;;  %v2552_v25 = vrot.slane %v2550_v24, 1  ;;  %v2671_v24 = vrot.slane %v5927_v31, 1 }
 0x100   : > { %2996 = vmatprep.mubr.bf16.mxu0 %v2534_v44  ;;  %4414 = vmatprep.mubr.bf16.mxu1 %v5792_v34 }
 0x101   : > { %v2553_v34 = vor.u32 %v2552_v25, %v2548_v33  ;;  %v2670_v33 = vsel %vm571_vm0, %v2668_v56, %v2669_v54  ;;  %v2608_v56 = vshrl.u32 %v6085_v45, 16 }
 0x103   : > { %v2558_v42 = vsel %vm362_vm1, %v2553_v34, %v2557_v63 }
 0x107   : > { %2997 = vmatmul.mubr.bf16.gmra.mrb[104].mxu0 %v5965_v12  ;;  %4415 = vmatmul.mubr.bf16.gmra.mrb[8].mxu1 %v5796_v0 }
 0x108   : > { %3004 = vmatprep.mubr.bf16.mxu0 %v2546_v18  ;;  %4418 = vmatprep.mubr.bf16.mxu1 %v5809_v51  ;;  %v6064_v18 = vld [vmem:[%s5290_s7 + $0xa8] sm:$0xff]  }
 0x109   : > { %v2598_v34 = vshll.u32 %v6064_v18, 16 }
 0x10a   : > { %v3934_v43 = vpop.f32.mrb[0].mxu0 }
 0x10b   : > { %v3935_v28 = vpop.f32.mrb[1].mxu0  ;;  %v2600_v55 = vrot.slane %v2598_v34, 1 }
 0x10c   : > { %v6003_v30 = vadd.f32 %v3935_v28, %v3934_v43  ;;  %v3937_v40 = vpop.f32.mrb[2].mxu0  ;;  %v2584_v28 = vshrl.u32 %v6043_v6, 16 }
 0x10d   : > { %v3938_v36 = vpop.f32.mrb[3].mxu0 }
 0x10e   : > { %v6011_v10 = vadd.f32 %v3938_v36, %v3937_v40  ;;  %v2588_v40 = vrot.slane %v2586_v7, 1  ;;  %v2591_v36 = vshll.u32 %v6051_v11, 16 }
 0x10f   : > { %3005 = vmatmul.mubr.bf16.gmra.mrb[108].mxu0 %v5981_v47  ;;  %4419 = vmatmul.mubr.bf16.gmra.mrb[12].mxu1 %v5824_v29  ;;  %v2579_v29 = vshll.u32 %v6033_v53, 16 }
 0x110   : > { %3012 = vmatprep.mubr.bf16.mxu0 %v2558_v42  ;;  %4438 = vmatprep.mubr.bf16.mxu1 %v5842_v39  ;;  %v2667_v39 = vsel %vm571_vm0, %v2665_v23, %v2666_v50  ;;  %v2593_v25 = vrot.slane %v2591_v36, 1  ;;  %v6091_v23 = vld [vmem:[%s5290_s7 + $0xbc] ss:$0 sps:$4 sm:$0x11]   ;;  %v2610_v50 = vshll.u32 %v6085_v45, 16 }
 0x111   : > { %v2581_v44 = vrot.slane %v2579_v29, 1  ;;  %v2615_v47 = vshll.u32 %v6091_v23, 16 }
 0x112   : > { %v3940_v32 = vpop.f32.mrb[4].mxu0  ;;  %v2612_v54 = vrot.slane %v2610_v50, 1 }
 0x113   : > { %v3941_v20 = vpop.f32.mrb[5].mxu0  ;;  %v2582_v43 = vsel %vm362_vm1, %v2577_v46, %v2581_v44 }
 0x114   : > { %v6026_v0 = vadd.f32 %v3941_v20, %v3940_v32  ;;  %v3943_v14 = vpop.f32.mrb[6].mxu0  ;;  %v2674_v32 = vrot.slane %v5946_v22, 1  ;;  %v2675_v20 = vrot.slane %v5954_v15, 1  ;;  %v2679_v15 = vsel %vm571_vm0, %v2677_v62, %v2678_v35 }
 0x115   : > { %v3944_v13 = vpop.f32.mrb[7].mxu0  ;;  %v2613_v36 = vor.u32 %v2612_v54, %v2608_v56 }
 0x116   : > { %v6029_v51 = vadd.f32 %v3944_v13, %v3943_v14  ;;  %v2596_v13 = vshrl.u32 %v6064_v18, 16  ;;  %v2676_v22 = vsel %vm571_vm0, %v2674_v32, %v2675_v20  ;;  %v2690_v32 = vrot.slane %v6033_v53, 1 }
 0x117   : > { %3013 = vmatmul.mubr.bf16.gmra.mrb[112].mxu0 %v5994_v48  ;;  %4439 = vmatmul.mubr.bf16.vlgmr.msra.gmra.mrb[80].mxu1 %v5846_v60  ;;  %v2672_v60 = vrot.slane %v5935_v26, 1  ;;  %v2589_v26 = vor.u32 %v2588_v40, %v2584_v28 }
 0x118   : > { %3020 = vmatprep.mubr.bf16.mxu0 %v2570_v2  ;;  %4442 = vmatprep.mubr.bf16.mxu1 %v2667_v39  ;;  %v2601_v12 = vor.u32 %v2600_v55, %v2596_v13  ;;  %v2620_v55 = vshrl.u32 %v6104_v17, 16 }
 0x119   : > { %v2673_v21 = vsel %vm571_vm0, %v2671_v24, %v2672_v60  ;;  %v2594_v14 = vsel %vm362_vm1, %v2589_v26, %v2593_v25  ;;  %v2686_v26 = vrot.slane %v6009_v58, 1  ;;  %v2687_v25 = vrot.slane %v6016_v1, 1  ;;  %v6129_v1 = vld [vmem:[%s5290_s7 + $0xcc] sm:$0xff]  }
 0x11a   : > { %v3946_v5 = vpop.f32.mrb[8].mxu0  ;;  %v2606_v7 = vsel %vm362_vm1, %v2601_v12, %v2605_v59 }
 0x11b   : > { %v3947_v9 = vpop.f32.mrb[9].mxu0 }
 0x11c   : > { %v6047_v8 = vadd.f32 %v3947_v9, %v3946_v5  ;;  %v3949_v16 = vpop.f32.mrb[10].mxu0  ;;  %v2683_v5 = vrot.slane %v5994_v48, 1  ;;  %v2684_v9 = vrot.slane %v5999_v19, 1  ;;  %v2682_v48 = vsel %vm571_vm0, %v2680_v3, %v2681_v27  ;;  %v6141_v27 = vld [vmem:[%s5290_s7 + $0xd4] ss:$0 sps:$4 sm:$0x11]  }
 0x11d   : > { %v3950_v57 = vpop.f32.mrb[11].mxu0 }
 0x11e   : > { %v6054_v4 = vadd.f32 %v3950_v57, %v3949_v16 }
 0x11f   : > { %3021 = vmatmul.mubr.bf16.gmra.mrb[116].mxu0 %v6009_v58  ;;  %4443 = vmatmul.mubr.bf16.gmra.mrb[84].mxu1 %v2670_v33  ;;  %v2617_v33 = vrot.slane %v2615_v47, 1 }
 0x120   : > { %3028 = vmatprep.mubr.bf16.mxu0 %v2582_v43  ;;  %4446 = vmatprep.mubr.bf16.mxu1 %v2673_v21  ;;  %v2685_v43 = vsel %vm571_vm0, %v2683_v5, %v2684_v9  ;;  %v6116_v21 = vld [vmem:[%s5290_s7 + $0xc8] ss:$0 sps:$4 sm:$0x11]   ;;  %v2692_v9 = vrot.slane %v6043_v6, 1  ;;  %s161_s7 = sand.u32 1, %s5116_s13  }
 0x121   : > { %v2618_v13 = vsel %vm362_vm1, %v2613_v36, %v2617_v33  ;;  %v2627_v58 = vshll.u32 %v6116_v21, 16  ;;  %s3549_s10 = sshll.u32 %s161_s7, 8  ;;  %s6495_s16 = scalar_lea.sflag [#allocation3], %s161_s7 }
 0x122   : > { %v3952_v37 = vpop.f32.mrb[12].mxu0  ;;  %s6382_s11 = scalar_lea.vmem [#allocation2], %s3549_s10 }
 0x123   : > { %v3953_v31 = vpop.f32.mrb[13].mxu0  ;;  %v2629_v3 = vrot.slane %v2627_v58, 1  ;;  %s3483_s19 = sshll.u32 %s6382_s11, 4  ;;  %s6488_s19 = int_to_ptr.vmem [resolvable:$true] %s3483_s19 }
 0x124   : > { %v6073_v63 = vadd.f32 %v3953_v31, %v3952_v37  ;;  %v3955_v41 = vpop.f32.mrb[14].mxu0  ;;  %v2622_v37 = vshll.u32 %v6104_v17, 16  ;;  %s5062_s26 = scalar_lea.vmem %s6488_s19, 4096  ;;  %p5069_p0 = scmp.lt.s32.totalorder %s6488_s19, %s5067_s28 }
 0x125   : > { %v3956_v42 = vpop.f32.mrb[15].mxu0  ;;  %p5063_p11 = scmp.ne.s32.totalorder %s6488_s19, %s5062_s26  ;;  %p5070_p1 = scmp.lt.s32.totalorder %s5068_s29, %s5062_s26 }
 0x126   : > { %v6079_v52 = vadd.f32 %v3956_v42, %v3955_v41  ;;  %v2689_v41 = vrot.slane %v6024_v61, 1  ;;  %v2624_v38 = vrot.slane %v2622_v37, 1 }
 0x127   : > { %3029 = vmatmul.mubr.bf16.gmra.mrb[120].mxu0 %v6024_v61  ;;  %4447 = vmatmul.mubr.bf16.gmra.mrb[88].mxu1 %v2676_v22  ;;  %v2688_v61 = vsel %vm571_vm0, %v2686_v26, %v2687_v25  ;;  %p5064_p12 = pnand %p5063_p11, %p5187_p5  ;;  %p5071_p2 = por %p5070_p1, %p5069_p0 }
 0x128   : > { %3036 = vmatprep.mubr.bf16.mxu0 %v2594_v14  ;;  %4450 = vmatprep.mubr.bf16.mxu1 %v2679_v15  ;;  %v2691_v12 = vsel %vm571_vm0, %v2689_v41, %v2690_v32  ;;  %v2698_v41 = vrot.slane %v6085_v45, 1  ;;  %v2699_v32 = vrot.slane %v6091_v23, 1 }
 0x129   : > { %p5065_p13 = pneg %p5064_p12 }
 0x12a   : > { %v3958_v2 = vpop.f32.mrb[16].mxu0  ;;  %v4070_v57 = vpop.f32.mrb[16].mxu1 }
 0x12b   : > { %v3959_v29 = vpop.f32.mrb[17].mxu0  ;;  %v4071_v44 = vpop.f32.mrb[17].mxu1  ;;  %p5072_p3 = pnand %p5071_p2, %p5065_p13 }
 0x12c   : > { %v6098_v39 = vadd.f32 %v3959_v29, %v3958_v2  ;;  %v3961_v16 = vpop.f32.mrb[18].mxu0  ;;  %v6109_v19 = vadd.f32 %v4071_v44, %v4070_v57  ;;  %v4073_v60 = vpop.f32.mrb[18].mxu1  ;;  %v2625_v2 = vor.u32 %v2624_v38, %v2620_v55  ;;  %v2634_v29 = vshll.u32 %v6129_v1, 16 }
 0x12d   : > { %v3962_v46 = vpop.f32.mrb[19].mxu0  ;;  %v4074_v28 = vpop.f32.mrb[19].mxu1  ;;  %v2696_v44 = vrot.slane %v6070_v49, 1 }
 0x12e   : > { %v6106_v24 = vadd.f32 %v3962_v46, %v3961_v16  ;;  %v6113_v40 = vadd.f32 %v4074_v28, %v4073_v60  ;;  %v2693_v16 = vrot.slane %v6051_v11, 1  ;;  %v2695_v46 = vrot.slane %v6064_v18, 1 }
 0x12f   : > { %3037 = vmatmul.mubr.bf16.gmra.mrb[124].mxu0 %v6043_v6  ;;  %4451 = vmatmul.mubr.bf16.gmra.mrb[92].mxu1 %v2682_v48  ;;  %v2630_v60 = vsel %vm362_vm1, %v2625_v2, %v2629_v3  ;;  %v2636_v28 = vrot.slane %v2634_v29, 1  ;;  %v2639_v6 = vshll.u32 %v6141_v27, 16  ;;  %v2704_v29 = vrot.slane %v6129_v1, 1 }
 0x130   : > { %3044 = vmatprep.mubr.bf16.mxu0 %v2606_v7  ;;  %4454 = vmatprep.mubr.bf16.mxu1 %v2685_v43  ;;  %v2632_v43 = vshrl.u32 %v6129_v1, 16  ;;  %v2694_v11 = vsel %vm571_vm0, %v2692_v9, %v2693_v16  ;;  %v2697_v33 = vsel %vm571_vm0, %v2695_v46, %v2696_v44 }
 0x131   : > { %v2641_v25 = vrot.slane %v2639_v6, 1 }
 0x132   : > { %v3964_v31 = vpop.f32.mrb[20].mxu0  ;;  %v4076_v62 = vpop.f32.mrb[20].mxu1  ;;  %v2637_v26 = vor.u32 %v2636_v28, %v2632_v43 }
 0x133   : > { %v3965_v34 = vpop.f32.mrb[21].mxu0  ;;  %v4077_v14 = vpop.f32.mrb[21].mxu1 }
 0x134   : > { %v6123_v20 = vadd.f32 %v3965_v34, %v3964_v31  ;;  %v3967_v42 = vpop.f32.mrb[22].mxu0  ;;  %v6134_v53 = vadd.f32 %v4077_v14, %v4076_v62  ;;  %v4079_v15 = vpop.f32.mrb[22].mxu1  ;;  %v2701_v62 = vrot.slane %v6104_v17, 1 }
 0x135   : > { %v3968_v35 = vpop.f32.mrb[23].mxu0  ;;  %v4080_v59 = vpop.f32.mrb[23].mxu1 }
 0x136   : > { %v6131_v22 = vadd.f32 %v3968_v35, %v3967_v42  ;;  %v6138_v50 = vadd.f32 %v4080_v59, %v4079_v15  ;;  %v2702_v35 = vrot.slane %v6116_v21, 1 }
 0x137   : > { %3045 = vmatmul.mubr.bf16.gmra.mrb[128].mxu0 %v6064_v18  ;;  %4455 = vmatmul.mubr.bf16.gmra.mrb[0].mxu1 %v2688_v61  ;;  %v2642_v61 = vsel %vm362_vm1, %v2637_v26, %v2641_v25 }
 0x138   : > { %3052 = vmatprep.mubr.bf16.mxu0 %v2618_v13  ;;  %4458 = vmatprep.mubr.bf16.mxu1 %v2691_v12  ;;  %v2700_v12 = vsel %vm571_vm0, %v2698_v41, %v2699_v32  ;;  %v2703_v59 = vsel %vm571_vm0, %v2701_v62, %v2702_v35 }
 0x13a   : > { %v3970_v5 = vpop.f32.mrb[24].mxu0  ;;  %v4082_v54 = vpop.f32.mrb[24].mxu1 }
 0x13b   : > { %v3971_v57 = vpop.f32.mrb[25].mxu0  ;;  %v4083_v48 = vpop.f32.mrb[25].mxu1 }
 0x13c   : > { %v6148_v7 = vadd.f32 %v3971_v57, %v3970_v5  ;;  %v3973_v56 = vpop.f32.mrb[26].mxu0  ;;  %v6156_v18 = vadd.f32 %v4083_v48, %v4082_v54  ;;  %v4085_v49 = vpop.f32.mrb[26].mxu1  ;;  %v2705_v5 = vrot.slane %v6141_v27, 1 }
 0x13d   : > { %v3974_v47 = vpop.f32.mrb[27].mxu0  ;;  %v4086_v37 = vpop.f32.mrb[27].mxu1 }
 0x13e   : > { %v6153_v36 = vadd.f32 %v3974_v47, %v3973_v56  ;;  %v6160_v31 = vadd.f32 %v4086_v37, %v4085_v49  ;;  %v2706_v54 = vsel %vm571_vm0, %v2704_v29, %v2705_v5 }
 0x13f   : > { %3053 = vmatmul.mubr.bf16.gmra.mrb[132].mxu0 %v6085_v45  ;;  %4459 = vmatmul.mubr.bf16.gmra.mrb[4].mxu1 %v2694_v11 }
 0x140   : > { %3060 = vmatprep.mubr.bf16.mxu0 %v2630_v60  ;;  %4462 = vmatprep.mubr.bf16.mxu1 %v2697_v33 }
 0x142   : > { %v3976_v34 = vpop.f32.mrb[28].mxu0  ;;  %v4088_v55 = vpop.f32.mrb[28].mxu1 }
 0x143   : > { %v3977_v42 = vpop.f32.mrb[29].mxu0  ;;  %v4089_v58 = vpop.f32.mrb[29].mxu1 }
 0x144   : > { %v6166_v14 = vadd.f32 %v3977_v42, %v3976_v34  ;;  %v3979_v13 = vpop.f32.mrb[30].mxu0  ;;  %v6172_v45 = vadd.f32 %v4089_v58, %v4088_v55  ;;  %v4091_v23 = vpop.f32.mrb[30].mxu1 }
 0x145   : > { %v3980_v38 = vpop.f32.mrb[31].mxu0  ;;  %v4092_v21 = vpop.f32.mrb[31].mxu1 }
 0x146   : > { %v6169_v15 = vadd.f32 %v3980_v38, %v3979_v13  ;;  %v6176_v2 = vadd.f32 %v4092_v21, %v4091_v23 }
 0x147   : > { %3061 = vmatmul.mubr.bf16.gmra.mrb[136].mxu0 %v6104_v17  ;;  %4463 = vmatmul.mubr.bf16.gmra.mrb[8].mxu1 %v2700_v12 }
 0x148   : > { %3068 = vmatprep.mubr.bf16.mxu0 %v2642_v61  ;;  %4466 = vmatprep.mubr.bf16.mxu1 %v2703_v59 }
 0x14a   : > { %v3982_v3 = vpop.f32.mrb[32].mxu0  ;;  %v4094_v46 = vpop.f32.mrb[32].mxu1 }
 0x14b   : > { %v3983_v9 = vpop.f32.mrb[33].mxu0  ;;  %v4095_v56 = vpop.f32.mrb[33].mxu1 }
 0x14c   : > { %v3984_v16 = vadd.f32 %v3983_v9, %v3982_v3  ;;  %v3985_v57 = vpop.f32.mrb[34].mxu0  ;;  %v6181_v47 = vadd.f32 %v4095_v56, %v4094_v46  ;;  %v4097_v48 = vpop.f32.mrb[34].mxu1 }
 0x14d   : > { %v3986_v44 = vpop.f32.mrb[35].mxu0  ;;  %v4098_v60 = vpop.f32.mrb[35].mxu1 }
 0x14e   : > { %v3987_v17 = vadd.f32 %v3986_v44, %v3985_v57  ;;  %v6184_v43 = vadd.f32 %v4098_v60, %v4097_v48 }
 0x14f   : > { %3069 = vmatmul.mubr.bf16.gmra.mrb[140].mxu0 %v6129_v1  ;;  %4467 = vmatmul.mubr.bf16.gmra.mrb[12].mxu1 %v2706_v54 }
 0x152   : > { %v3988_v28 = vpop.f32.mrb[36].mxu0  ;;  %v4100_v49 = vpop.f32.mrb[36].mxu1 }
 0x153   : > { %v3989_v27 = vpop.f32.mrb[37].mxu0  ;;  %v4101_v37 = vpop.f32.mrb[37].mxu1 }
 0x154   : > { %v3990_v6 = vadd.f32 %v3989_v27, %v3988_v28  ;;  %v3991_v11 = vpop.f32.mrb[38].mxu0  ;;  %v6186_v25 = vadd.f32 %v4101_v37, %v4100_v49  ;;  %v4103_v34 = vpop.f32.mrb[38].mxu1 }
 0x155   : > { %v3992_v33 = vpop.f32.mrb[39].mxu0  ;;  %v4104_v41 = vpop.f32.mrb[39].mxu1 }
 0x156   : > { %v3993_v26 = vadd.f32 %v3992_v33, %v3991_v11  ;;  %v6188_v32 = vadd.f32 %v4104_v41, %v4103_v34 }
 0x15a   : > { %v3994_v42 = vpop.f32.mrb[40].mxu0  ;;  %v4106_v13 = vpop.f32.mrb[40].mxu1 }
 0x15b   : > { %v3995_v1 = vpop.f32.mrb[41].mxu0  ;;  %v4107_v38 = vpop.f32.mrb[41].mxu1 }
 0x15c   : > { %v3996_v62 = vadd.f32 %v3995_v1, %v3994_v42  ;;  %v3997_v35 = vpop.f32.mrb[42].mxu0  ;;  %v6190_v61 = vadd.f32 %v4107_v38, %v4106_v13  ;;  %v4109_v12 = vpop.f32.mrb[42].mxu1 }
 0x15d   : > { %v3998_v55 = vpop.f32.mrb[43].mxu0  ;;  %v4110_v23 = vpop.f32.mrb[43].mxu1 }
 0x15e   : > { %v3999_v58 = vadd.f32 %v3998_v55, %v3997_v35  ;;  %v6192_v59 = vadd.f32 %v4110_v23, %v4109_v12 }
 0x162   : > { %v4000_v21 = vpop.f32.mrb[44].mxu0  ;;  %v4112_v9 = vpop.f32.mrb[44].mxu1 }
 0x163   : > { %v4001_v3 = vpop.f32.mrb[45].mxu0  ;;  %v4113_v46 = vpop.f32.mrb[45].mxu1 }
 0x164   : > { %v6194_v29 = vadd.f32 %v4001_v3, %v4000_v21  ;;  %v4003_v5 = vpop.f32.mrb[46].mxu0  ;;  %v6196_v56 = vadd.f32 %v4113_v46, %v4112_v9  ;;  %v4115_v54 = vpop.f32.mrb[46].mxu1 }
 0x165   : > { %v4004_v57 = vpop.f32.mrb[47].mxu0  ;;  %v4116_v48 = vpop.f32.mrb[47].mxu1 }
 0x166   : > { %v4005_v44 = vadd.f32 %v4004_v57, %v4003_v5  ;;  %v6198_v60 = vadd.f32 %v4116_v48, %v4115_v54 }
 0x16a   : > { %v4006_v28 = vpop.f32.mrb[48].mxu0  ;;  %v4118_v11 = vpop.f32.mrb[48].mxu1 }
 0x16b   : > { %v4007_v27 = vpop.f32.mrb[49].mxu0  ;;  %v4119_v37 = vpop.f32.mrb[49].mxu1 }
 0x16c   : > { %v6200_v49 = vadd.f32 %v4007_v27, %v4006_v28  ;;  %v4009_v33 = vpop.f32.mrb[50].mxu0  ;;  %v4120_v41 = vadd.f32 %v4119_v37, %v4118_v11  ;;  %v4121_v42 = vpop.f32.mrb[50].mxu1 }
 0x16d   : > { %v4010_v34 = vpop.f32.mrb[51].mxu0  ;;  %v4122_v35 = vpop.f32.mrb[51].mxu1 }
 0x16e   : > { %v6202_v1 = vadd.f32 %v4010_v34, %v4009_v33  ;;  %v6204_v13 = vadd.f32 %v4120_v41, %v3984_v16  ;;  %v4123_v55 = vadd.f32 %v4122_v35, %v4121_v42 }
 0x170   : > { %v6206_v38 = vadd.f32 %v4123_v55, %v3987_v17 }
 0x172   : > { %v4012_v12 = vpop.f32.mrb[52].mxu0  ;;  %v4124_v21 = vpop.f32.mrb[52].mxu1 }
 0x173   : > { %v4013_v23 = vpop.f32.mrb[53].mxu0  ;;  %v4125_v9 = vpop.f32.mrb[53].mxu1 }
 0x174   : > { %v6208_v3 = vadd.f32 %v4013_v23, %v4012_v12  ;;  %v4015_v5 = vpop.f32.mrb[54].mxu0  ;;  %v4126_v46 = vadd.f32 %v4125_v9, %v4124_v21  ;;  %v4127_v54 = vpop.f32.mrb[54].mxu1 }
 0x175   : > { %v4016_v57 = vpop.f32.mrb[55].mxu0  ;;  %v4128_v28 = vpop.f32.mrb[55].mxu1 }
 0x176   : > { %v6210_v48 = vadd.f32 %v4016_v57, %v4015_v5  ;;  %v6212_v27 = vadd.f32 %v4126_v46, %v3990_v6  ;;  %v4129_v16 = vadd.f32 %v4128_v28, %v4127_v54 }
 0x178   : > { %v6214_v11 = vadd.f32 %v4129_v16, %v3993_v26 }
 0x17a   : > { %6542 = vst [vmem:[#allocation5_spill] sm:$0xff] %v6214_v11  ;;  %v4018_v17 = vpop.f32.mrb[56].mxu0  ;;  %v4130_v37 = vpop.f32.mrb[56].mxu1 }
 0x17b   : > { %v4019_v33 = vpop.f32.mrb[57].mxu0  ;;  %v4131_v42 = vpop.f32.mrb[57].mxu1 }
 0x17c   : > { %v6216_v34 = vadd.f32 %v4019_v33, %v4018_v17  ;;  %v4021_v41 = vpop.f32.mrb[58].mxu0  ;;  %v4132_v55 = vadd.f32 %v4131_v42, %v4130_v37  ;;  %v4133_v12 = vpop.f32.mrb[58].mxu1 }
 0x17d   : > { %v4022_v35 = vpop.f32.mrb[59].mxu0  ;;  %v4134_v21 = vpop.f32.mrb[59].mxu1 }
 0x17e   : > { %v6218_v23 = vadd.f32 %v4022_v35, %v4021_v41  ;;  %v6220_v5 = vadd.f32 %v4132_v55, %v3996_v62  ;;  %v4135_v6 = vadd.f32 %v4134_v21, %v4133_v12 }
 0x180   : > { %v6222_v9 = vadd.f32 %v4135_v6, %v3999_v58 }
 0x182   : > { %v4024_v26 = vpop.f32.mrb[60].mxu0  ;;  %v4136_v46 = vpop.f32.mrb[60].mxu1 }
 0x183   : > { %v4025_v57 = vpop.f32.mrb[61].mxu0  ;;  %v4137_v16 = vpop.f32.mrb[61].mxu1 }
 0x184   : > { %v6224_v54 = vadd.f32 %v4025_v57, %v4024_v26  ;;  %v4027_v28 = vpop.f32.mrb[62].mxu0  ;;  %v4138_v33 = vadd.f32 %v4137_v16, %v4136_v46  ;;  %v4139_v11 = vpop.f32.mrb[62].mxu1 }
 0x185   : > { %v4028_v17 = vpop.f32.mrb[63].mxu0  ;;  %v4140_v41 = vpop.f32.mrb[63].mxu1 }
 0x186   : > { %v6226_v37 = vadd.f32 %v4028_v17, %v4027_v28  ;;  %v6229_v42 = vadd.f32 %v4138_v33, %v6194_v29  ;;  %v4141_v62 = vadd.f32 %v4140_v41, %v4139_v11 }
 0x188   : > { %v6231_v35 = vadd.f32 %v4141_v62, %v4005_v44 }
 0x18a   : > { %v4344_v58 = vpop.f32.mrb[64].mxu0  ;;  %v4142_v21 = vpop.f32.mrb[64].mxu1 }
 0x18b   : > { %v1032_v55 = vadd.f32 %v4344_v58, %v6026_v0  ;;  %v1023_v12 = vpop.f32.mrb[65].mxu0  ;;  %v4143_v46 = vpop.f32.mrb[65].mxu1 }
 0x18c   : > { %v1024_v6 = vadd.f32 %v6003_v30, %v1023_v12  ;;  %v4345_v26 = vpop.f32.mrb[66].mxu0  ;;  %v4144_v44 = vadd.f32 %v4143_v46, %v4142_v21  ;;  %v4145_v11 = vpop.f32.mrb[66].mxu1 }
 0x18d   : > { %v6236_v57 = vadd.f32 %v6134_v53, %v1032_v55  ;;  %v1035_v28 = vadd.f32 %v4345_v26, %v6029_v51  ;;  %v1026_v16 = vpop.f32.mrb[67].mxu0  ;;  %v4146_v33 = vpop.f32.mrb[67].mxu1 }
 0x18e   : > { %v6240_v29 = vadd.f32 %v6109_v19, %v1024_v6  ;;  %v1027_v17 = vadd.f32 %v6011_v10, %v1026_v16  ;;  %v6247_v30 = vadd.f32 %v4144_v44, %v6200_v49  ;;  %v4147_v41 = vadd.f32 %v4146_v33, %v4145_v11 }
 0x18f   : > { %v6244_v0 = vadd.f32 %v6138_v50, %v1035_v28 }
 0x190   : > { %v6250_v53 = vadd.f32 %v6113_v40, %v1027_v17  ;;  %v6253_v51 = vadd.f32 %v4147_v41, %v6202_v1 }
 0x192   : > { %v4348_v19 = vpop.f32.mrb[68].mxu0  ;;  %v4148_v55 = vpop.f32.mrb[68].mxu1 }
 0x193   : > { %v1048_v62 = vadd.f32 %v4348_v19, %v6073_v63  ;;  %v1039_v58 = vpop.f32.mrb[69].mxu0  ;;  %v4149_v49 = vpop.f32.mrb[69].mxu1 }
 0x194   : > { %v1040_v10 = vadd.f32 %v6047_v8, %v1039_v58  ;;  %v4349_v50 = vpop.f32.mrb[70].mxu0  ;;  %v4150_v1 = vadd.f32 %v4149_v49, %v4148_v55  ;;  %v4151_v26 = vpop.f32.mrb[70].mxu1 }
 0x195   : > { %v6258_v12 = vadd.f32 %v6172_v45, %v1048_v62  ;;  %v1051_v21 = vadd.f32 %v4349_v50, %v6079_v52  ;;  %v1042_v40 = vpop.f32.mrb[71].mxu0  ;;  %v4152_v28 = vpop.f32.mrb[71].mxu1 }
 0x196   : > { %v6262_v6 = vadd.f32 %v6156_v18, %v1040_v10  ;;  %v1043_v46 = vadd.f32 %v6054_v4, %v1042_v40  ;;  %v6269_v8 = vadd.f32 %v4150_v1, %v6208_v3  ;;  %v4153_v16 = vadd.f32 %v4152_v28, %v4151_v26 }
 0x197   : > { %v6266_v63 = vadd.f32 %v6176_v2, %v1051_v21 }
 0x198   : > { %v6272_v45 = vadd.f32 %v6160_v31, %v1043_v46  ;;  %v6275_v52 = vadd.f32 %v4153_v16, %v6210_v48 }
 0x19a   : > { %v4352_v18 = vpop.f32.mrb[72].mxu0  ;;  %v4154_v17 = vpop.f32.mrb[72].mxu1 }
 0x19b   : > { %v1064_v44 = vadd.f32 %v4352_v18, %v6123_v20  ;;  %v1055_v11 = vpop.f32.mrb[73].mxu0  ;;  %v4155_v3 = vpop.f32.mrb[73].mxu1 }
 0x19c   : > { %v1056_v4 = vadd.f32 %v6098_v39, %v1055_v11  ;;  %v4353_v2 = vpop.f32.mrb[74].mxu0  ;;  %v4156_v48 = vadd.f32 %v4155_v3, %v4154_v17  ;;  %v4157_v62 = vpop.f32.mrb[74].mxu1 }
 0x19d   : > { %v6280_v33 = vadd.f32 %v6186_v25, %v1064_v44  ;;  %v1067_v41 = vadd.f32 %v4353_v2, %v6131_v22  ;;  %v1058_v31 = vpop.f32.mrb[75].mxu0  ;;  %v4158_v55 = vpop.f32.mrb[75].mxu1 }
 0x19e   : > { %v6284_v19 = vadd.f32 %v6181_v47, %v1056_v4  ;;  %v1059_v58 = vadd.f32 %v6106_v24, %v1058_v31  ;;  %v6291_v39 = vadd.f32 %v4156_v48, %v6216_v34  ;;  %v4159_v10 = vadd.f32 %v4158_v55, %v4157_v62 }
 0x19f   : > { %v6288_v20 = vadd.f32 %v6188_v32, %v1067_v41 }
 0x1a0   : > { %v4599_v25 = vadd.f32 %v6184_v43, %v1059_v58  ;;  %v6295_v22 = vadd.f32 %v4159_v10, %v6218_v23 }
 0x1a2   : > { %v4356_v50 = vpop.f32.mrb[76].mxu0  ;;  %v4160_v21 = vpop.f32.mrb[76].mxu1 }
 0x1a3   : > { %v1080_v47 = vadd.f32 %v4356_v50, %v6166_v14  ;;  %v1071_v49 = vpop.f32.mrb[77].mxu0  ;;  %v4161_v1 = vpop.f32.mrb[77].mxu1 }
 0x1a4   : > { %v1072_v24 = vadd.f32 %v6148_v7, %v1071_v49  ;;  %v4357_v40 = vpop.f32.mrb[78].mxu0  ;;  %v4162_v23 = vadd.f32 %v4161_v1, %v4160_v21  ;;  %v4163_v46 = vpop.f32.mrb[78].mxu1 }
 0x1a5   : > { %v6300_v32 = vadd.f32 %v6196_v56, %v1080_v47  ;;  %v1083_v34 = vadd.f32 %v4357_v40, %v6169_v15  ;;  %v1074_v26 = vpop.f32.mrb[79].mxu0  ;;  %v4164_v16 = vpop.f32.mrb[79].mxu1 }
 0x1a6   : > { %v6304_v43 = vadd.f32 %v6190_v61, %v1072_v24  ;;  %v1075_v28 = vadd.f32 %v6153_v36, %v1074_v26  ;;  %v6311_v7 = vadd.f32 %v4162_v23, %v6224_v54  ;;  %v4165_v18 = vadd.f32 %v4164_v16, %v4163_v46 }
 0x1a7   : > { %v6308_v14 = vadd.f32 %v6198_v60, %v1083_v34 }
 0x1a8   : > { %v4639_v56 = vadd.f32 %v6192_v59, %v1075_v28  ;;  %v6315_v15 = vadd.f32 %v4165_v18, %v6226_v37 }
 0x1aa   : > { %v4206_v44 = vpop.f32.mrb[80].mxu0 }
 0x1ab   : > { %v4207_v61 = vpop.f32.mrb[81].mxu0 }
 0x1ac   : > { %v4208_v11 = vadd.f32 %v4207_v61, %v4206_v44  ;;  %v4209_v17 = vpop.f32.mrb[82].mxu0 }
 0x1ad   : > { %v4210_v4 = vpop.f32.mrb[83].mxu0 }
 0x1ae   : > { %v6318_v36 = vadd.f32 %v6240_v29, %v4208_v11  ;;  %v4211_v60 = vadd.f32 %v4210_v4, %v4209_v17 }
 0x1b0   : > { %v6321_v2 = vadd.f32 %v6250_v53, %v4211_v60 }
 0x1b2   : > { %v4212_v54 = vpop.f32.mrb[84].mxu0 }
 0x1b3   : > { %v4213_v3 = vpop.f32.mrb[85].mxu0 }
 0x1b4   : > { %v4214_v41 = vadd.f32 %v4213_v3, %v4212_v54  ;;  %v4215_v59 = vpop.f32.mrb[86].mxu0 }
 0x1b5   : > { %v4216_v31 = vpop.f32.mrb[87].mxu0 }
 0x1b6   : > { %v4492_v37 = vadd.f32 %v6236_v57, %v4214_v41  ;;  %v4217_v48 = vadd.f32 %v4216_v31, %v4215_v59 }
 0x1b8   : > { %v6325_v62 = vadd.f32 %v6244_v0, %v4217_v48 }
 0x1ba   : > { %v4218_v58 = vpop.f32.mrb[88].mxu0 }
 0x1bb   : > { %v4219_v55 = vpop.f32.mrb[89].mxu0 }
 0x1bc   : > { %v4220_v10 = vadd.f32 %v4219_v55, %v4218_v58  ;;  %v4221_v29 = vpop.f32.mrb[90].mxu0 }
 0x1bd   : > { %v4222_v50 = vpop.f32.mrb[91].mxu0 }
 0x1be   : > { %v6328_v47 = vadd.f32 %v6262_v6, %v4220_v10  ;;  %v4223_v53 = vadd.f32 %v4222_v50, %v4221_v29 }
 0x1c0   : > { %v6331_v49 = vadd.f32 %v6272_v45, %v4223_v53 }
 0x1c2   : > { %v4224_v21 = vpop.f32.mrb[92].mxu0 }
 0x1c3   : > { %v4225_v24 = vpop.f32.mrb[93].mxu0 }
 0x1c4   : > { %v4226_v40 = vadd.f32 %v4225_v24, %v4224_v21  ;;  %v4227_v57 = vpop.f32.mrb[94].mxu0 }
 0x1c5   : > { %v4228_v1 = vpop.f32.mrb[95].mxu0 }
 0x1c6   : > { %v6334_v0 = vadd.f32 %v6258_v12, %v4226_v40  ;;  %v4229_v34 = vadd.f32 %v4228_v1, %v4227_v57 }
 0x1c8   : > { %v6337_v26 = vadd.f32 %v6266_v63, %v4229_v34 }
 0x1ca   : > { %v4230_v23 = vpop.f32.mrb[96].mxu0 }
 0x1cb   : > { %v4231_v46 = vpop.f32.mrb[97].mxu0 }
 0x1cc   : > { %v4232_v6 = vadd.f32 %v4231_v46, %v4230_v23  ;;  %v4233_v28 = vpop.f32.mrb[98].mxu0 }
 0x1cd   : > { %v4234_v16 = vpop.f32.mrb[99].mxu0 }
 0x1ce   : > { %v6340_v45 = vadd.f32 %v6284_v19, %v4232_v6  ;;  %v4235_v18 = vadd.f32 %v4234_v16, %v4233_v28 }
 0x1d0   : > { %v6342_v44 = vadd.f32 %v4599_v25, %v4235_v18 }
 0x1d2   : > { %v4236_v61 = vpop.f32.mrb[100].mxu0 }
 0x1d3   : > { %v4237_v11 = vpop.f32.mrb[101].mxu0 }
 0x1d4   : > { %v4238_v17 = vadd.f32 %v4237_v11, %v4236_v61  ;;  %v4239_v12 = vpop.f32.mrb[102].mxu0 }
 0x1d5   : > { %v4240_v4 = vpop.f32.mrb[103].mxu0 }
 0x1d6   : > { %v6345_v60 = vadd.f32 %v6280_v33, %v4238_v17  ;;  %v4241_v63 = vadd.f32 %v4240_v4, %v4239_v12 }
 0x1d8   : > { %v6348_v54 = vadd.f32 %v6288_v20, %v4241_v63 }
 0x1da   : > { %v4242_v3 = vpop.f32.mrb[104].mxu0 }
 0x1db   : > { %v4243_v41 = vpop.f32.mrb[105].mxu0 }
 0x1dc   : > { %v4244_v19 = vadd.f32 %v4243_v41, %v4242_v3  ;;  %v4245_v59 = vpop.f32.mrb[106].mxu0 }
 0x1dd   : > { %v4246_v31 = vpop.f32.mrb[107].mxu0 }
 0x1de   : > { %v6351_v25 = vadd.f32 %v6304_v43, %v4244_v19  ;;  %v4247_v48 = vadd.f32 %v4246_v31, %v4245_v59 }
 0x1e0   : > { %v6353_v58 = vadd.f32 %v4639_v56, %v4247_v48  ;;  %v6365_v56 = vld [vmem:[%s6538_s2] ss:$0 sm:$0xff] }
 0x1e2   : > { %v4248_v55 = vpop.f32.mrb[108].mxu0 }
 0x1e3   : > { %v4249_v33 = vpop.f32.mrb[109].mxu0 }
 0x1e4   : > { %v4250_v10 = vadd.f32 %v4249_v33, %v4248_v55  ;;  %v4251_v29 = vpop.f32.mrb[110].mxu0 }
 0x1e5   : > { %v4252_v50 = vpop.f32.mrb[111].mxu0 }
 0x1e6   : > { %v6356_v20 = vadd.f32 %v6300_v32, %v4250_v10  ;;  %v4253_v53 = vadd.f32 %v4252_v50, %v4251_v29 }
 0x1e8   : > { %v6359_v21 = vadd.f32 %v6308_v14, %v4253_v53 }
 0x1ea   : > { %v4254_v24 = vpop.f32.mrb[112].mxu0  ;;  %v4440_v40 = vpop.f32.mrb[80].mxu1 }
 0x1eb   : > { %v4255_v43 = vpop.f32.mrb[113].mxu0  ;;  %v4495_v34 = vadd.f32 %v4492_v37, %v4440_v40  ;;  %v3111_v32 = vpop.f32.mrb[81].mxu1 }
 0x1ec   : > { %v4256_v57 = vadd.f32 %v4255_v43, %v4254_v24  ;;  %v4257_v1 = vpop.f32.mrb[114].mxu0  ;;  %v4505_v14 = vadd.f32 %v6318_v36, %v3111_v32  ;;  %v4441_v6 = vpop.f32.mrb[82].mxu1 }
 0x1ed   : > { %v4258_v23 = vpop.f32.mrb[115].mxu0  ;;  %v3375_v16 = vadd.f32 %v4495_v34, %v6365_v56  ;;  %v4515_v18 = vadd.f32 %v6325_v62, %v4441_v6  ;;  %v3114_v61 = vpop.f32.mrb[83].mxu1 }
 0x1ee   : > { %v6370_v46 = vadd.f32 %v6204_v13, %v4256_v57  ;;  %v4259_v28 = vadd.f32 %v4258_v23, %v4257_v1  ;;  %v3373_v11 = vadd.f32 %v4505_v14, %v6365_v56  ;;  %v4525_v37 = vadd.f32 %v6321_v2, %v3114_v61 }
 0x1ef   : > { %v3407_v12 = vmax.f32 %v3375_v16, 0.0  ;;  %v3376_v13 = vadd.f32 %v4515_v18, %v6365_v56 }
 0x1f0   : > { %v6377_v17 = vadd.f32 %v6206_v38, %v4259_v28  ;;  %v3405_v4 = vmax.f32 %v3373_v11, 0.0  ;;  %v3374_v36 = vadd.f32 %v4525_v37, %v6365_v56 }
 0x1f1   : > { %3439 = vst [vmem:[%s6382_s11 + $0x10] sm:$0xff] %v3407_v12  ;;  %v3408_v62 = vmax.f32 %v3376_v13, 0.0 }
 0x1f2   : > { %v4260_v63 = vpop.f32.mrb[116].mxu0  ;;  %3437 = vst [vmem:[%s6382_s11] sm:$0xff] %v3405_v4  ;;  %v3406_v38 = vmax.f32 %v3374_v36, 0.0  ;;  %v4444_v41 = vpop.f32.mrb[84].mxu1 }
 0x1f3   : > { %v4261_v3 = vpop.f32.mrb[117].mxu0  ;;  %3440 = vst [vmem:[%s6382_s11 + $0x18] sm:$0xff] %v3408_v62  ;;  %v4535_v59 = vadd.f32 %v6334_v0, %v4444_v41  ;;  %v3127_v31 = vpop.f32.mrb[85].mxu1  ;;  %v6543_v0 = vld [vmem:[#allocation5_spill] sm:$0xff] }
 0x1f4   : > { %v4262_v2 = vadd.f32 %v4261_v3, %v4260_v63  ;;  %v4263_v19 = vpop.f32.mrb[118].mxu0  ;;  %3438 = vst [vmem:[%s6382_s11 + $0x8] sm:$0xff] %v3406_v38  ;;  %v4545_v33 = vadd.f32 %v6328_v47, %v3127_v31  ;;  %v4445_v10 = vpop.f32.mrb[86].mxu1 }
 0x1f5   : > { %v4264_v48 = vpop.f32.mrb[119].mxu0  ;;  %v3379_v50 = vadd.f32 %v4535_v59, %v6365_v56  ;;  %v4555_v53 = vadd.f32 %v6337_v26, %v4445_v10  ;;  %v3130_v24 = vpop.f32.mrb[87].mxu1 }
 0x1f6   : > { %v6390_v55 = vadd.f32 %v6212_v27, %v4262_v2  ;;  %v4265_v29 = vadd.f32 %v4264_v48, %v4263_v19  ;;  %v3377_v43 = vadd.f32 %v4545_v33, %v6365_v56  ;;  %v4565_v57 = vadd.f32 %v6331_v49, %v3130_v24 }
 0x1f7   : > { %v3411_v27 = vmax.f32 %v3379_v50, 0.0  ;;  %v3380_v1 = vadd.f32 %v4555_v53, %v6365_v56 }
 0x1f8   : > { %v6397_v40 = vadd.f32 %v6543_v0, %v4265_v29  ;;  %v3409_v47 = vmax.f32 %v3377_v43, 0.0  ;;  %v3378_v34 = vadd.f32 %v4565_v57, %v6365_v56 }
 0x1f9   : > { %3443 = vst [vmem:[%s6382_s11 + $0x30] sm:$0xff] %v3411_v27  ;;  %v3412_v23 = vmax.f32 %v3380_v1, 0.0 }
 0x1fa   : > { %v4266_v32 = vpop.f32.mrb[120].mxu0  ;;  %3441 = vst [vmem:[%s6382_s11 + $0x20] sm:$0xff] %v3409_v47  ;;  %v3410_v14 = vmax.f32 %v3378_v34, 0.0  ;;  %v4448_v6 = vpop.f32.mrb[88].mxu1 }
 0x1fb   : > { %v4267_v26 = vpop.f32.mrb[121].mxu0  ;;  %3444 = vst [vmem:[%s6382_s11 + $0x38] sm:$0xff] %v3412_v23  ;;  %v4575_v18 = vadd.f32 %v6345_v60, %v4448_v6  ;;  %v3143_v49 = vpop.f32.mrb[89].mxu1 }
 0x1fc   : > { %v4268_v28 = vadd.f32 %v4267_v26, %v4266_v32  ;;  %v4269_v16 = vpop.f32.mrb[122].mxu0  ;;  %3442 = vst [vmem:[%s6382_s11 + $0x28] sm:$0xff] %v3410_v14  ;;  %v4585_v37 = vadd.f32 %v6340_v45, %v3143_v49  ;;  %v4449_v12 = vpop.f32.mrb[90].mxu1 }
 0x1fd   : > { %v4270_v61 = vpop.f32.mrb[123].mxu0  ;;  %v3383_v4 = vadd.f32 %v4575_v18, %v6365_v56  ;;  %v4595_v36 = vadd.f32 %v6348_v54, %v4449_v12  ;;  %v3146_v63 = vpop.f32.mrb[91].mxu1 }
 0x1fe   : > { %v6408_v11 = vadd.f32 %v6220_v5, %v4268_v28  ;;  %v4271_v13 = vadd.f32 %v4270_v61, %v4269_v16  ;;  %v3381_v62 = vadd.f32 %v4585_v37, %v6365_v56  ;;  %v4605_v3 = vadd.f32 %v6342_v44, %v3146_v63 }
 0x1ff   : > { %v3415_v5 = vmax.f32 %v3383_v4, 0.0  ;;  %v3384_v38 = vadd.f32 %v4595_v36, %v6365_v56 }
 0x200   : > { %v6415_v60 = vadd.f32 %v6222_v9, %v4271_v13  ;;  %v3413_v45 = vmax.f32 %v3381_v62, 0.0  ;;  %v3382_v41 = vadd.f32 %v4605_v3, %v6365_v56 }
 0x201   : > { %3447 = vst [vmem:[%s6382_s11 + $0x50] sm:$0xff] %v3415_v5  ;;  %v3416_v19 = vmax.f32 %v3384_v38, 0.0 }
 0x202   : > { %v4272_v2 = vpop.f32.mrb[124].mxu0  ;;  %3445 = vst [vmem:[%s6382_s11 + $0x40] sm:$0xff] %v3413_v45  ;;  %v3414_v59 = vmax.f32 %v3382_v41, 0.0  ;;  %v4452_v31 = vpop.f32.mrb[92].mxu1 }
 0x203   : > { %v4273_v54 = vpop.f32.mrb[125].mxu0  ;;  %3448 = vst [vmem:[%s6382_s11 + $0x58] sm:$0xff] %v3416_v19  ;;  %v4615_v9 = vadd.f32 %v6356_v20, %v4452_v31  ;;  %v3159_v44 = vpop.f32.mrb[93].mxu1 }
 0x204   : > { %v4274_v48 = vadd.f32 %v4273_v54, %v4272_v2  ;;  %v4275_v33 = vpop.f32.mrb[126].mxu0  ;;  %3446 = vst [vmem:[%s6382_s11 + $0x48] sm:$0xff] %v3414_v59  ;;  %v4625_v50 = vadd.f32 %v6351_v25, %v3159_v44  ;;  %v4453_v53 = vpop.f32.mrb[94].mxu1 }
 0x205   : > { %v4276_v10 = vpop.f32.mrb[127].mxu0  ;;  %v3387_v43 = vadd.f32 %v4615_v9, %v6365_v56  ;;  %v4635_v0 = vadd.f32 %v6359_v21, %v4453_v53  ;;  %v3162_v57 = vpop.f32.mrb[95].mxu1 }
 0x206   : > { %v4687_v29 = vadd.f32 %v6229_v42, %v4274_v48  ;;  %v4277_v24 = vadd.f32 %v4276_v10, %v4275_v33  ;;  %v3385_v27 = vadd.f32 %v4625_v50, %v6365_v56  ;;  %v4645_v1 = vadd.f32 %v6353_v58, %v3162_v57 }
 0x207   : > { %v3419_v47 = vmax.f32 %v3387_v43, 0.0  ;;  %v3388_v42 = vadd.f32 %v4635_v0, %v6365_v56 }
 0x208   : > { %v4705_v20 = vadd.f32 %v6231_v35, %v4277_v24  ;;  %v3417_v25 = vmax.f32 %v3385_v27, 0.0  ;;  %v3386_v34 = vadd.f32 %v4645_v1, %v6365_v56 }
 0x209   : > { %3451 = vst [vmem:[%s6382_s11 + $0x70] sm:$0xff] %v3419_v47  ;;  %v3420_v23 = vmax.f32 %v3388_v42, 0.0 }
 0x20a   : > { %v4278_v32 = vpop.f32.mrb[128].mxu0  ;;  %3449 = vst [vmem:[%s6382_s11 + $0x60] sm:$0xff] %v3417_v25  ;;  %v3418_v21 = vmax.f32 %v3386_v34, 0.0  ;;  %v4456_v14 = vpop.f32.mrb[0].mxu1 }
 0x20b   : > { %v4279_v26 = vpop.f32.mrb[129].mxu0  ;;  %3452 = vst [vmem:[%s6382_s11 + $0x78] sm:$0xff] %v3420_v23  ;;  %v4654_v35 = vadd.f32 %v6390_v55, %v4456_v14  ;;  %v3175_v58 = vpop.f32.mrb[1].mxu1 }
 0x20c   : > { %v4280_v6 = vadd.f32 %v4279_v26, %v4278_v32  ;;  %v4281_v28 = vpop.f32.mrb[130].mxu0  ;;  %3450 = vst [vmem:[%s6382_s11 + $0x68] sm:$0xff] %v3418_v21  ;;  %v4663_v49 = vadd.f32 %v6370_v46, %v3175_v58  ;;  %v4457_v61 = vpop.f32.mrb[2].mxu1 }
 0x20d   : > { %v4282_v16 = vpop.f32.mrb[131].mxu0  ;;  %v3391_v12 = vadd.f32 %v4654_v35, %v6365_v56  ;;  %v4672_v13 = vadd.f32 %v6397_v40, %v4457_v61  ;;  %v3178_v4 = vpop.f32.mrb[3].mxu1 }
 0x20e   : > { %v4732_v18 = vadd.f32 %v6247_v30, %v4280_v6  ;;  %v4283_v37 = vadd.f32 %v4282_v16, %v4281_v28  ;;  %v3389_v36 = vadd.f32 %v4663_v49, %v6365_v56  ;;  %v4681_v63 = vadd.f32 %v6377_v17, %v3178_v4 }
 0x20f   : > { %v3423_v62 = vmax.f32 %v3391_v12, 0.0  ;;  %v3392_v30 = vadd.f32 %v4672_v13, %v6365_v56 }
 0x210   : > { %v4750_v55 = vadd.f32 %v6253_v51, %v4283_v37  ;;  %v3421_v46 = vmax.f32 %v3389_v36, 0.0  ;;  %v3390_v3 = vadd.f32 %v4681_v63, %v6365_v56 }
 0x211   : > { %3455 = vst [vmem:[%s6382_s11 + $0x90] sm:$0xff] %v3423_v62  ;;  %v3424_v38 = vmax.f32 %v3392_v30, 0.0 }
 0x212   : > { %v4284_v5 = vpop.f32.mrb[132].mxu0  ;;  %3453 = vst [vmem:[%s6382_s11 + $0x80] sm:$0xff] %v3421_v46  ;;  %v3422_v40 = vmax.f32 %v3390_v3, 0.0  ;;  %v4460_v41 = vpop.f32.mrb[4].mxu1 }
 0x213   : > { %v4285_v45 = vpop.f32.mrb[133].mxu0  ;;  %3456 = vst [vmem:[%s6382_s11 + $0x98] sm:$0xff] %v3424_v38  ;;  %v4690_v51 = vadd.f32 %v4687_v29, %v4460_v41  ;;  %v3191_v54 = vpop.f32.mrb[5].mxu1 }
 0x214   : > { %v4286_v2 = vadd.f32 %v4285_v45, %v4284_v5  ;;  %v4287_v19 = vpop.f32.mrb[134].mxu0  ;;  %3454 = vst [vmem:[%s6382_s11 + $0x88] sm:$0xff] %v3422_v40  ;;  %v4699_v31 = vadd.f32 %v6408_v11, %v3191_v54  ;;  %v4461_v48 = vpop.f32.mrb[6].mxu1 }
 0x215   : > { %v4288_v17 = vpop.f32.mrb[135].mxu0  ;;  %v3395_v9 = vadd.f32 %v4690_v51, %v6365_v56  ;;  %v4708_v44 = vadd.f32 %v4705_v20, %v4461_v48  ;;  %v3194_v10 = vpop.f32.mrb[7].mxu1 }
 0x216   : > { %v4723_v59 = vadd.f32 %v6269_v8, %v4286_v2  ;;  %v4289_v33 = vadd.f32 %v4288_v17, %v4287_v19  ;;  %v3393_v50 = vadd.f32 %v4699_v31, %v6365_v56  ;;  %v4717_v53 = vadd.f32 %v6415_v60, %v3194_v10 }
 0x217   : > { %v3427_v24 = vmax.f32 %v3395_v9, 0.0  ;;  %v3396_v43 = vadd.f32 %v4708_v44, %v6365_v56 }
 0x218   : > { %v4741_v29 = vadd.f32 %v6275_v52, %v4289_v33  ;;  %v3425_v8 = vmax.f32 %v3393_v50, 0.0  ;;  %v3394_v11 = vadd.f32 %v4717_v53, %v6365_v56 }
 0x219   : > { %3459 = vst [vmem:[%s6382_s11 + $0xb0] sm:$0xff] %v3427_v24  ;;  %v3428_v57 = vmax.f32 %v3396_v43, 0.0 }
 0x21a   : > { %v4290_v0 = vpop.f32.mrb[136].mxu0  ;;  %3457 = vst [vmem:[%s6382_s11 + $0xa0] sm:$0xff] %v3425_v8  ;;  %v3426_v20 = vmax.f32 %v3394_v11, 0.0  ;;  %v4464_v1 = vpop.f32.mrb[8].mxu1 }
 0x21b   : > { %v4291_v27 = vpop.f32.mrb[137].mxu0  ;;  %3460 = vst [vmem:[%s6382_s11 + $0xb8] sm:$0xff] %v3428_v57  ;;  %v4726_v52 = vadd.f32 %v4723_v59, %v4464_v1  ;;  %v3207_v25 = vpop.f32.mrb[9].mxu1 }
 0x21c   : > { %v4292_v47 = vadd.f32 %v4291_v27, %v4290_v0  ;;  %v4293_v42 = vpop.f32.mrb[138].mxu0  ;;  %3458 = vst [vmem:[%s6382_s11 + $0xa8] sm:$0xff] %v3426_v20  ;;  %v4735_v32 = vadd.f32 %v4732_v18, %v3207_v25  ;;  %v4465_v23 = vpop.f32.mrb[10].mxu1 }
 0x21d   : > { %v4294_v60 = vpop.f32.mrb[139].mxu0  ;;  %v3399_v21 = vadd.f32 %v4726_v52, %v6365_v56  ;;  %v4744_v14 = vadd.f32 %v4741_v29, %v4465_v23  ;;  %v3210_v6 = vpop.f32.mrb[11].mxu1 }
 0x21e   : > { %v4768_v34 = vadd.f32 %v6291_v39, %v4292_v47  ;;  %v4295_v26 = vadd.f32 %v4294_v60, %v4293_v42  ;;  %v3397_v28 = vadd.f32 %v4735_v32, %v6365_v56  ;;  %v4753_v58 = vadd.f32 %v4750_v55, %v3210_v6 }
 0x21f   : > { %v3431_v16 = vmax.f32 %v3399_v21, 0.0  ;;  %v3400_v49 = vadd.f32 %v4744_v14, %v6365_v56 }
 0x220   : > { %v4786_v35 = vadd.f32 %v6295_v22, %v4295_v26  ;;  %v3429_v61 = vmax.f32 %v3397_v28, 0.0  ;;  %v3398_v39 = vadd.f32 %v4753_v58, %v6365_v56 }
 0x221   : > { %3463 = vst [vmem:[%s6382_s11 + $0xd0] sm:$0xff] %v3431_v16  ;;  %v3432_v37 = vmax.f32 %v3400_v49, 0.0 }
 0x222   : > { %v4296_v18 = vpop.f32.mrb[140].mxu0  ;;  %3461 = vst [vmem:[%s6382_s11 + $0xc0] sm:$0xff] %v3429_v61  ;;  %v3430_v13 = vmax.f32 %v3398_v39, 0.0  ;;  %v4468_v4 = vpop.f32.mrb[12].mxu1 }
 0x223   : > { %v4297_v12 = vpop.f32.mrb[141].mxu0  ;;  %3464 = vst [vmem:[%s6382_s11 + $0xd8] sm:$0xff] %v3432_v37  ;;  %v3223_v62 = vpop.f32.mrb[13].mxu1 }
 0x224   : > { %v4298_v36 = vadd.f32 %v4297_v12, %v4296_v18  ;;  %v4299_v63 = vpop.f32.mrb[142].mxu0  ;;  %3462 = vst [vmem:[%s6382_s11 + $0xc8] sm:$0xff] %v3430_v13  ;;  %v4771_v30 = vadd.f32 %v4768_v34, %v3223_v62  ;;  %v4469_v46 = vpop.f32.mrb[14].mxu1 }
 0x225   : > { %v4300_v22 = vpop.f32.mrb[143].mxu0  ;;  %v3226_v5 = vpop.f32.mrb[15].mxu1 }
 0x226   : > { %v4759_v55 = vadd.f32 %v6311_v7, %v4298_v36  ;;  %v4301_v3 = vadd.f32 %v4300_v22, %v4299_v63  ;;  %v3401_v45 = vadd.f32 %v4771_v30, %v6365_v56  ;;  %v4789_v41 = vadd.f32 %v4786_v35, %v3226_v5 }
 0x228   : > { %v4762_v38 = vadd.f32 %v4759_v55, %v4468_v4  ;;  %v4777_v40 = vadd.f32 %v6315_v15, %v4301_v3  ;;  %v3433_v19 = vmax.f32 %v3401_v45, 0.0  ;;  %v3402_v7 = vadd.f32 %v4789_v41, %v6365_v56 }
 0x22a   : > { %v3403_v2 = vadd.f32 %v4762_v38, %v6365_v56  ;;  %v4780_v51 = vadd.f32 %v4777_v40, %v4469_v46  ;;  %3465 = vst [vmem:[%s6382_s11 + $0xe0] sm:$0xff] %v3433_v19  ;;  %v3434_v59 = vmax.f32 %v3402_v7, 0.0 }
 0x22c   : > { %v3435_v54 = vmax.f32 %v3403_v2, 0.0  ;;  %v3404_v17 = vadd.f32 %v4780_v51, %v6365_v56  ;;  %3466 = vst [vmem:[%s6382_s11 + $0xe8] sm:$0xff] %v3434_v59 }
 0x22e   : > { %3467 = vst [vmem:[%s6382_s11 + $0xf0] sm:$0xff] %v3435_v54  ;;  %v3436_v15 = vmax.f32 %v3404_v17, 0.0 }
 0x230   : > { %3468 = vst [vmem:[%s6382_s11 + $0xf8] sm:$0xff] %v3436_v15 }
 0x231   : > { %5075 = shalt.err (!%p5072_p3)
}
 0x232   : > { %s5076_s30 = scalar_lea.hbm %s6486_s25, 4096  ;;  %s5080_s6 = scalar_lea.hbm %s6539_s3, 8192 }
 0x233   : > { %p5077_p4 = scmp.ne.s32.totalorder %s6486_s25, %s5076_s30  ;;  %p5081_p9 = scmp.lt.u32.totalorder %s6486_s25, %s6539_s3 }
 0x234   : > { %p5082_p10 = scmp.lt.u32.totalorder %s5080_s6, %s5076_s30  ;;  %p5084_p12 = scmp.lt.u32.totalorder %s5076_s30, %s6486_s25 }
 0x235   : > { %p5078_p7 = pnand %p5077_p4, %p5187_p5 }
 0x236   : > { %p5083_p11 = por %p5082_p10, %p5081_p9 }
 0x237   : > { %p5079_p8 = pneg %p5078_p7 }
 0x238   : > { %p5085_p13 = por %p5084_p12, %p5083_p11 }
 0x23a   : > { %p5086_p0 = pnand %p5085_p13, %p5079_p8 }
 0x23c   : > { %5089 = shalt.err (!%p5086_p0)
}
 0x23d   : > { %s5127_s9 = smov 128   ;;  %s5128_s10 = smov 8  }
 0x23e   : > { %4839 = dma.vmem_to_hbm [thread:$0]  (%p5187_p5), %s6488_s19, 4096, %s6486_s25, %s6495_s16, %s5127_s9, %s5127_s9, %s5128_s10  }
 0x23f PF: > { %p4845_p1 = scmp.ge.s32.totalorder %s5124_s15, 2  ;;  %s3498_s11 = sand.u32 1, %s5112_s12  }
 0x240   : > { %s3499_s17 = scalar_lea.sflag [#allocation3], %s3498_s11 }
 0x241   : > { %p4842_p2 = pnand %p4845_p1, %p5191_p6 }
 0x243   : > { %5107 = dma.done.wait (!%p4842_p2), %s3499_s17, 4096  }
 0x244   : > { %5109 = vsyncadd (!%p4842_p2), %s3499_s17, 4294963200  ;;  %p13_p3 = scmp.ge.s32.totalorder %s5174_s18, 4   ;;  %s6544_s12 = smov %s5116_s13 }
 0x245   : > { %s6545_s13 = smov %s5120_s14  ;;  %s6546_s14 = smov %s5185_s21 }
 0x246   : > { %s6547_s15 = smov %s5174_s18  ;;  %15 = sbr.rel (!%p13_p3) target bundleno = 3 (0x3), region = 71 }
 0x24d   :  { %3504 = vsyncpa [#allocation3], 1 }
 0x24e   :  { %3506 = vsyncpa [#allocation3 + $0x1], 1 }

</bundles_post_ra>
